<compile_context>
chip_gen: v7x
topology: tpu7x:2x2x1
jax: 0.10.0
libtpu: 0.0.40
codegen_flags: <defaults>
</compile_context>

<pallas_src>
import jax
import jax.numpy as jnp
from jax.experimental import pallas as pl
from jax.experimental.pallas import tpu as pltpu


# --------------------------------------------------------------------------- #
# Small helpers
# --------------------------------------------------------------------------- #
def _round_up(x, m):
    return ((x + m - 1) // m) * m


def _device_kind():
    try:
        return jax.devices()[0].device_kind.lower()
    except Exception:
        return ""


def _vmem_capacity_bytes():
    """Physical per-TensorCore VMEM (128 MiB on v5e/v6e, 64 MiB on v7x)."""
    try:
        cap = int(pltpu.get_tpu_info().vmem_capacity_bytes)
        if cap > 0:
            return cap
    except Exception:
        pass
    return (64 << 20) if "v7" in _device_kind() else (128 << 20)


def _num_tensorcores_per_chip():
    """2 on v7x (megacore sharding of 'parallel' grid axes), else 1."""
    try:
        info = pltpu.get_tpu_info()
        for name in ("num_tensorcores", "tensorcore_count", "num_cores"):
            v = getattr(info, name, None)
            if isinstance(v, int) and v > 0:
                return v
    except Exception:
        pass
    return 2 if "v7" in _device_kind() else 1


# --------------------------------------------------------------------------- #
# Kernel
# --------------------------------------------------------------------------- #
def _make_nnopt_kernel(num_hidden, compute_dtype):
    """Kernel closure over the (static) number of ReLU hidden layers."""

    def kernel(*refs):
        # refs = [x_ref,
        #         w0_t, b0, ..., w_{H-1}_t, b_{H-1},          (hidden, ReLU)
        #         w_last_t (folded, lane-padded),
        #         astar_t (lane-padded),
        #         b_last (folded, lane-padded, (1, z0_pad)),
        #         out_ref]
        x_ref = refs[0]
        w_last_ref = refs[-4]
        astar_ref = refs[-3]
        b_last_ref = refs[-2]
        out_ref = refs[-1]

        # x arrives in f32; cast to the bf16 MXU operand dtype in-kernel.
        x0 = x_ref[...].astype(compute_dtype)            # (bm, input_dim)
        h = x0
        for i in range(num_hidden):                       # statically unrolled
            w = refs[1 + 2 * i][...]                      # bf16 (in, out)
            b = refs[2 + 2 * i][...]                      # f32  (1, out)
            acc = jnp.dot(h, w, preferred_element_type=jnp.float32) + b
            h = jnp.maximum(acc, 0.0).astype(compute_dtype)

        # Folded head:
        #   z = h @ (Bstar W_last).T + x0 @ Astar.T + (Bstar b_last + bstar)
        # TODO(synk): once hidden/input dims are lane-aligned (128-multiples),
        # stack [W_last_folded; Astar] along K and feed [h | x0] as one matmul.
        z = (jnp.dot(h, w_last_ref[...], preferred_element_type=jnp.float32)
             + jnp.dot(x0, astar_ref[...], preferred_element_type=jnp.float32)
             + b_last_ref[...])
        out_ref[...] = z.astype(out_ref.dtype)            # (bm, 128) lane-dense

    return kernel


# --------------------------------------------------------------------------- #
# One-time parameter preparation (mirrors NNOPT.__init__ + operand plumbing)
# --------------------------------------------------------------------------- #
def prepare_nnopt_params(weights, biases, A, B, b, *,
                         compute_dtype=jnp.bfloat16, lane_pad=128):
    """Compute Astar/Bstar/bstar from (A, B, b), fold the affine head into the
    last Linear, pre-transpose all weights to (in, out), cast MXU operands to
    bf16 and zero-pad the head to 128 output lanes.  Call once per weight
    update; the result is reused by every nnopt_forward call."""
    A = jnp.asarray(A, jnp.float32)
    B = jnp.asarray(B, jnp.float32)
    b = jnp.asarray(b, jnp.float32)
    z0_dim = B.shape[1]

    chunk = B.T @ jnp.linalg.inv(B @ B.T)                  # (z0_dim, m)
    Astar = -(chunk @ A)                                   # (z0_dim, input_dim)
    Bstar = jnp.eye(z0_dim, dtype=jnp.float32) - chunk @ B # (z0_dim, z0_dim)
    bstar = (chunk @ b).squeeze(-1)                        # (z0_dim,)

    z0_pad = _round_up(z0_dim, lane_pad)
    pad = z0_pad - z0_dim

    hidden = []
    for w, bb in zip(weights[:-1], biases[:-1]):
        hidden.append((jnp.asarray(w).T.astype(compute_dtype),
                       jnp.asarray(bb).reshape(1, -1).astype(jnp.float32)))

    w_last = jnp.asarray(weights[-1], jnp.float32)
    b_last = jnp.asarray(biases[-1], jnp.float32)
    w_last_folded = Bstar @ w_last                         # (z0_dim, hidden)
    b_last_folded = Bstar @ b_last + bstar                 # (z0_dim,)

    w_last_t = jnp.pad(w_last_folded.T.astype(compute_dtype), ((0, 0), (0, pad)))
    astar_t = jnp.pad(Astar.T.astype(compute_dtype), ((0, 0), (0, pad)))
    b_last_row = jnp.pad(b_last_folded.reshape(1, -1).astype(jnp.float32),
                         ((0, 0), (0, pad)))

    return dict(
        hidden=hidden, w_last_t=w_last_t, astar_t=astar_t, b_last_row=b_last_row,
        input_dim=int(jnp.asarray(weights[0]).shape[1]),
        z0_dim=int(z0_dim), z0_pad=int(z0_pad), compute_dtype=compute_dtype,
        # f32 copies kept only for reference checking / debugging:
        Astar=Astar, Bstar=Bstar, bstar=bstar)


# --------------------------------------------------------------------------- #
# Forward wrapper
# --------------------------------------------------------------------------- #
def nnopt_forward(x, params, *, bm=None, out_dtype=jnp.float32):
    """Pallas wrapper: the grid tiles the batch; all parameters are full-array
    resident VMEM blocks (single-buffered).  Handles arbitrary batch via
    padding; returns (batch, z0_dim) in out_dtype."""
    batch, input_dim = x.shape
    assert input_dim == params["input_dim"], "input_dim mismatch with params"
    z0_pad, z0_dim = params["z0_pad"], params["z0_dim"]

    num_tc = _num_tensorcores_per_chip()
    vmem_budget = int(0.75 * _vmem_capacity_bytes())       # ~48 MiB v7x, ~96 MiB v5e/v6e

    # ---- batch tile selection ------------------------------------------------
    if bm is None:
        # one big tile on single-TC chips; exactly num_tc parallel steps on v7x
        target_steps = max(1, num_tc)
        bm = min(512, _round_up(max(1, -(-batch // target_steps)), 16))
    bm = max(16, _round_up(min(bm, _round_up(batch, 16)), 16))

    param_arrays = ([a for pair in params["hidden"] for a in pair]
                    + [params["w_last_t"], params["astar_t"], params["b_last_row"]])
    param_bytes = sum(int(a.size) * a.dtype.itemsize for a in param_arrays)
    out_isz = jnp.dtype(out_dtype).itemsize

    def _budget(bm_, param_factor):
        # x / out blocks are double-buffered by the pipeline; params are not
        # (param_factor=1) unless the single-buffer path is unavailable.
        return (2 * bm_ * input_dim * x.dtype.itemsize
                + 2 * bm_ * z0_pad * out_isz
                + param_factor * param_bytes + (2 << 20))

    # Shrink bm (instead of silently clamping the VMEM limit) if the footprint
    # would exceed the budget - only matters once hidden dims are scaled up.
    while bm > 16 and _budget(bm, 1) > vmem_budget:
        bm = max(16, _round_up(bm // 2, 16))

    padded_batch = _round_up(batch, bm)
    x_p = x if padded_batch == batch else jnp.pad(x, ((0, padded_batch - batch), (0, 0)))
    grid = (padded_batch // bm,)

    kernel = _make_nnopt_kernel(len(params["hidden"]), params["compute_dtype"])

    def _call(single_buffer_params):
        pm = ({"pipeline_mode": pl.Buffered(1)} if single_buffer_params else {})
        operands = [x_p]
        in_specs = [pl.BlockSpec((bm, input_dim), lambda i: (i, 0))]
        for w_t, b_row in params["hidden"]:
            operands += [w_t, b_row]
            in_specs += [pl.BlockSpec(w_t.shape, lambda i: (0, 0), **pm),
                         pl.BlockSpec(b_row.shape, lambda i: (0, 0), **pm)]
        operands += [params["w_last_t"], params["astar_t"], params["b_last_row"]]
        in_specs += [pl.BlockSpec(params["w_last_t"].shape, lambda i: (0, 0), **pm),
                     pl.BlockSpec(params["astar_t"].shape, lambda i: (0, 0), **pm),
                     pl.BlockSpec(params["b_last_row"].shape, lambda i: (0, 0), **pm)]
        out_spec = pl.BlockSpec((bm, z0_pad), lambda i: (i, 0))

        needed = _budget(bm, 1 if single_buffer_params else 2)
        vmem_limit = int(min(max(needed, 32 << 20), vmem_budget))

        return pl.pallas_call(
            kernel,
            out_shape=jax.ShapeDtypeStruct((padded_batch, z0_pad), out_dtype),
            grid_spec=pltpu.PrefetchScalarGridSpec(
                num_scalar_prefetch=0,
                grid=grid,
                in_specs=in_specs,
                out_specs=out_spec),
            compiler_params=pltpu.CompilerParams(
                dimension_semantics=("parallel",),
                vmem_limit_bytes=vmem_limit),
        )(*operands)

    try:
        out = _call(True)          # single-buffered constant params (preferred)
    except Exception:
        out = _call(False)         # conservative fallback: default double-buffering

    # Padded rows/lanes hold bias-only garbage - always slice before consuming.
    return out[:batch, :z0_dim]


# --------------------------------------------------------------------------- #
# Reference + test
# --------------------------------------------------------------------------- #
def _init_linear(key, in_dim, out_dim):
    """PyTorch-style Linear init: U(-1/sqrt(fan_in), 1/sqrt(fan_in))."""
    kw, kb = jax.random.split(key)
    bound = float(in_dim) ** -0.5
    w = jax.random.uniform(kw, (out_dim, in_dim), jnp.float32, -bound, bound)
    b = jax.random.uniform(kb, (out_dim,), jnp.float32, -bound, bound)
    return w, b


if __name__ == "__main__":
    # Small shapes consistent with the module's constructor.
    input_dim, hidden_dim, hidden_num, z0_dim = 16, 32, 3, 8
    m_constraints = 4          # rows of constraint matrices A, B and vector b
    batch = 256

    key = jax.random.PRNGKey(0)
    keys = jax.random.split(key, hidden_num + 5)

    # Constraint data: A (m, input_dim), B (m, z0_dim), b (m, 1)
    A = jax.random.normal(keys[0], (m_constraints, input_dim), jnp.float32)
    B = jax.random.normal(keys[1], (m_constraints, z0_dim), jnp.float32)
    bvec = jax.random.normal(keys[2], (m_constraints, 1), jnp.float32)

    # Trainable MLP: Linear(in,h), (hidden_num-1) x Linear(h,h), Linear(h,z0)
    dims = [input_dim] + [hidden_dim] * hidden_num + [z0_dim]
    weights, biases = [], []
    for li in range(len(dims) - 1):
        w, b = _init_linear(keys[3 + li], dims[li], dims[li + 1])
        weights.append(w)
        biases.append(b)

    x = jax.random.normal(keys[-1], (batch, input_dim), jnp.float32)

    # One-time parameter prep (hoisted out of the forward path).
    params = prepare_nnopt_params(weights, biases, A, B, bvec)

    z = jax.block_until_ready(nnopt_forward(x, params))
    assert z.shape == (batch, z0_dim)

    # (1) Semantic check vs. the exact f32 PyTorch-style reference
    #     (loose tolerance: kernel feeds the MXU bf16 operands).
    h = x
    for w, b in zip(weights[:-1], biases[:-1]):
        h = jnp.maximum(h @ w.T + b, 0.0)
    z0 = h @ weights[-1].T + biases[-1]
    z_f32 = z0 @ params["Bstar"].T + x @ params["Astar"].T + params["bstar"]
    assert jnp.allclose(z, z_f32, atol=5e-2, rtol=5e-2), "mismatch vs f32 reference"

    # (2) Tight check vs. a reference using the same folded/padded bf16 operands
    #     and f32 accumulation (isolates layout/fold bugs from bf16 rounding).
    x0 = x.astype(params["compute_dtype"])
    hh = x0
    for w_t, b_row in params["hidden"]:
        hh = jnp.maximum(
            jnp.dot(hh, w_t, preferred_element_type=jnp.float32) + b_row, 0.0
        ).astype(params["compute_dtype"])
    z_ref = (jnp.dot(hh, params["w_last_t"], preferred_element_type=jnp.float32)
             + jnp.dot(x0, params["astar_t"], preferred_element_type=jnp.float32)
             + params["b_last_row"])[:, :z0_dim]
    assert jnp.allclose(z, z_ref, atol=2e-3, rtol=2e-3), \
        "mismatch vs folded bf16 reference"

    print("KERNEL_OK")
</pallas_src>

<mosaic_0001>
module attributes {stable_mosaic.version = 11 : i64} {
  func.func @kernel(%arg0: i32, %arg1: memref<256x16xf32, #tpu.memory_space<vmem>>, %arg2: memref<16x32xbf16, #tpu.memory_space<vmem>>, %arg3: memref<1x32xf32, #tpu.memory_space<vmem>>, %arg4: memref<32x32xbf16, #tpu.memory_space<vmem>>, %arg5: memref<1x32xf32, #tpu.memory_space<vmem>>, %arg6: memref<32x32xbf16, #tpu.memory_space<vmem>>, %arg7: memref<1x32xf32, #tpu.memory_space<vmem>>, %arg8: memref<32x128xbf16, #tpu.memory_space<vmem>>, %arg9: memref<16x128xbf16, #tpu.memory_space<vmem>>, %arg10: memref<1x128xf32, #tpu.memory_space<vmem>>, %arg11: memref<256x128xf32, #tpu.memory_space<vmem>>) attributes {dimension_semantics = [#tpu.dimension_semantics<parallel>], iteration_bounds = array<i64: 1>, scalar_prefetch = 0 : i64, scratch_operands = 0 : i64, tpu.core_type = #tpu.core_type<tc>, window_params = [{transform_indices = @transform_0, window_bounds = array<i64: 256, 16>}, {pipeline_mode = #tpu.pipeline_mode<synchronous>, transform_indices = @transform_1, window_bounds = array<i64: 16, 32>}, {pipeline_mode = #tpu.pipeline_mode<synchronous>, transform_indices = @transform_2, window_bounds = array<i64: 1, 32>}, {pipeline_mode = #tpu.pipeline_mode<synchronous>, transform_indices = @transform_3, window_bounds = array<i64: 32, 32>}, {pipeline_mode = #tpu.pipeline_mode<synchronous>, transform_indices = @transform_4, window_bounds = array<i64: 1, 32>}, {pipeline_mode = #tpu.pipeline_mode<synchronous>, transform_indices = @transform_5, window_bounds = array<i64: 32, 32>}, {pipeline_mode = #tpu.pipeline_mode<synchronous>, transform_indices = @transform_6, window_bounds = array<i64: 1, 32>}, {pipeline_mode = #tpu.pipeline_mode<synchronous>, transform_indices = @transform_7, window_bounds = array<i64: 32, 128>}, {pipeline_mode = #tpu.pipeline_mode<synchronous>, transform_indices = @transform_8, window_bounds = array<i64: 16, 128>}, {pipeline_mode = #tpu.pipeline_mode<synchronous>, transform_indices = @transform_9, window_bounds = array<i64: 1, 128>}, {transform_indices = @transform_10, window_bounds = array<i64: 256, 128>}]} {
    %c0 = arith.constant 0 : index
    %c0_0 = arith.constant 0 : index
    %0 = vector.load %arg1[%c0, %c0_0] : memref<256x16xf32, #tpu.memory_space<vmem>>, vector<256x16xf32>
    %1 = arith.truncf %0 : vector<256x16xf32> to vector<256x16xbf16>
    %c0_1 = arith.constant 0 : index
    %c0_2 = arith.constant 0 : index
    %2 = vector.load %arg2[%c0_1, %c0_2] : memref<16x32xbf16, #tpu.memory_space<vmem>>, vector<16x32xbf16>
    %c0_3 = arith.constant 0 : index
    %c0_4 = arith.constant 0 : index
    %3 = vector.load %arg3[%c0_3, %c0_4] : memref<1x32xf32, #tpu.memory_space<vmem>>, vector<1x32xf32>
    %cst = arith.constant dense<0.000000e+00> : vector<256x32xf32>
    %4 = tpu.matmul %1, %2, %cst {dimension_numbers = #tpu.dot_dimension_numbers<[1], [0], [0], [1], [0, 0, 1, 1], [], []>} : vector<256x16xbf16>, vector<16x32xbf16>, vector<256x32xf32> -> vector<256x32xf32>
    %5 = vector.broadcast %3 : vector<1x32xf32> to vector<256x32xf32>
    %6 = arith.addf %4, %5 : vector<256x32xf32>
    %cst_5 = arith.constant 0.000000e+00 : f32
    %7 = vector.broadcast %cst_5 : f32 to vector<256x32xf32>
    %8 = arith.maximumf %6, %7 : vector<256x32xf32>
    %9 = arith.truncf %8 : vector<256x32xf32> to vector<256x32xbf16>
    %c0_6 = arith.constant 0 : index
    %c0_7 = arith.constant 0 : index
    %10 = vector.load %arg4[%c0_6, %c0_7] : memref<32x32xbf16, #tpu.memory_space<vmem>>, vector<32x32xbf16>
    %c0_8 = arith.constant 0 : index
    %c0_9 = arith.constant 0 : index
    %11 = vector.load %arg5[%c0_8, %c0_9] : memref<1x32xf32, #tpu.memory_space<vmem>>, vector<1x32xf32>
    %cst_10 = arith.constant dense<0.000000e+00> : vector<256x32xf32>
    %12 = tpu.matmul %9, %10, %cst_10 {dimension_numbers = #tpu.dot_dimension_numbers<[1], [0], [0], [1], [0, 0, 1, 1], [], []>} : vector<256x32xbf16>, vector<32x32xbf16>, vector<256x32xf32> -> vector<256x32xf32>
    %13 = vector.broadcast %11 : vector<1x32xf32> to vector<256x32xf32>
    %14 = arith.addf %12, %13 : vector<256x32xf32>
    %cst_11 = arith.constant 0.000000e+00 : f32
    %15 = vector.broadcast %cst_11 : f32 to vector<256x32xf32>
    %16 = arith.maximumf %14, %15 : vector<256x32xf32>
    %17 = arith.truncf %16 : vector<256x32xf32> to vector<256x32xbf16>
    %c0_12 = arith.constant 0 : index
    %c0_13 = arith.constant 0 : index
    %18 = vector.load %arg6[%c0_12, %c0_13] : memref<32x32xbf16, #tpu.memory_space<vmem>>, vector<32x32xbf16>
    %c0_14 = arith.constant 0 : index
    %c0_15 = arith.constant 0 : index
    %19 = vector.load %arg7[%c0_14, %c0_15] : memref<1x32xf32, #tpu.memory_space<vmem>>, vector<1x32xf32>
    %cst_16 = arith.constant dense<0.000000e+00> : vector<256x32xf32>
    %20 = tpu.matmul %17, %18, %cst_16 {dimension_numbers = #tpu.dot_dimension_numbers<[1], [0], [0], [1], [0, 0, 1, 1], [], []>} : vector<256x32xbf16>, vector<32x32xbf16>, vector<256x32xf32> -> vector<256x32xf32>
    %21 = vector.broadcast %19 : vector<1x32xf32> to vector<256x32xf32>
    %22 = arith.addf %20, %21 : vector<256x32xf32>
    %cst_17 = arith.constant 0.000000e+00 : f32
    %23 = vector.broadcast %cst_17 : f32 to vector<256x32xf32>
    %24 = arith.maximumf %22, %23 : vector<256x32xf32>
    %25 = arith.truncf %24 : vector<256x32xf32> to vector<256x32xbf16>
    %c0_18 = arith.constant 0 : index
    %c0_19 = arith.constant 0 : index
    %26 = vector.load %arg8[%c0_18, %c0_19] : memref<32x128xbf16, #tpu.memory_space<vmem>>, vector<32x128xbf16>
    %cst_20 = arith.constant dense<0.000000e+00> : vector<256x128xf32>
    %27 = tpu.matmul %25, %26, %cst_20 {dimension_numbers = #tpu.dot_dimension_numbers<[1], [0], [0], [1], [0, 0, 1, 1], [], []>} : vector<256x32xbf16>, vector<32x128xbf16>, vector<256x128xf32> -> vector<256x128xf32>
    %c0_21 = arith.constant 0 : index
    %c0_22 = arith.constant 0 : index
    %28 = vector.load %arg9[%c0_21, %c0_22] : memref<16x128xbf16, #tpu.memory_space<vmem>>, vector<16x128xbf16>
    %cst_23 = arith.constant dense<0.000000e+00> : vector<256x128xf32>
    %29 = tpu.matmul %1, %28, %cst_23 {dimension_numbers = #tpu.dot_dimension_numbers<[1], [0], [0], [1], [0, 0, 1, 1], [], []>} : vector<256x16xbf16>, vector<16x128xbf16>, vector<256x128xf32> -> vector<256x128xf32>
    %30 = arith.addf %27, %29 : vector<256x128xf32>
    %c0_24 = arith.constant 0 : index
    %c0_25 = arith.constant 0 : index
    %31 = vector.load %arg10[%c0_24, %c0_25] : memref<1x128xf32, #tpu.memory_space<vmem>>, vector<1x128xf32>
    %32 = vector.broadcast %31 : vector<1x128xf32> to vector<256x128xf32>
    %33 = arith.addf %30, %32 : vector<256x128xf32>
    %c0_26 = arith.constant 0 : index
    %c0_27 = arith.constant 0 : index
    %34 = vector.load %arg11[%c0_26, %c0_27] : memref<256x128xf32, #tpu.memory_space<vmem>>, vector<256x128xf32>
    tpu.vector_store %arg11[%c0_26, %c0_27], %33 {strides = array<i32>} : memref<256x128xf32, #tpu.memory_space<vmem>>, vector<256x128xf32>,
    return
  }
  func.func @transform_0(%arg0: i32) -> (i32, i32) {
    %c0_i32 = arith.constant 0 : i32
    %c0_i32_0 = arith.constant 0 : i32
    return %arg0, %c0_i32 : i32, i32
  }
  func.func @transform_1(%arg0: i32) -> (i32, i32) {
    %c0_i32 = arith.constant 0 : i32
    %c0_i32_0 = arith.constant 0 : i32
    %c0_i32_1 = arith.constant 0 : i32
    return %c0_i32, %c0_i32_0 : i32, i32
  }
  func.func @transform_2(%arg0: i32) -> (i32, i32) {
    %c0_i32 = arith.constant 0 : i32
    %c0_i32_0 = arith.constant 0 : i32
    %c0_i32_1 = arith.constant 0 : i32
    return %c0_i32, %c0_i32_0 : i32, i32
  }
  func.func @transform_3(%arg0: i32) -> (i32, i32) {
    %c0_i32 = arith.constant 0 : i32
    %c0_i32_0 = arith.constant 0 : i32
    %c0_i32_1 = arith.constant 0 : i32
    return %c0_i32, %c0_i32_0 : i32, i32
  }
  func.func @transform_4(%arg0: i32) -> (i32, i32) {
    %c0_i32 = arith.constant 0 : i32
    %c0_i32_0 = arith.constant 0 : i32
    %c0_i32_1 = arith.constant 0 : i32
    return %c0_i32, %c0_i32_0 : i32, i32
  }
  func.func @transform_5(%arg0: i32) -> (i32, i32) {
    %c0_i32 = arith.constant 0 : i32
    %c0_i32_0 = arith.constant 0 : i32
    %c0_i32_1 = arith.constant 0 : i32
    return %c0_i32, %c0_i32_0 : i32, i32
  }
  func.func @transform_6(%arg0: i32) -> (i32, i32) {
    %c0_i32 = arith.constant 0 : i32
    %c0_i32_0 = arith.constant 0 : i32
    %c0_i32_1 = arith.constant 0 : i32
    return %c0_i32, %c0_i32_0 : i32, i32
  }
  func.func @transform_7(%arg0: i32) -> (i32, i32) {
    %c0_i32 = arith.constant 0 : i32
    %c0_i32_0 = arith.constant 0 : i32
    %c0_i32_1 = arith.constant 0 : i32
    return %c0_i32, %c0_i32_0 : i32, i32
  }
  func.func @transform_8(%arg0: i32) -> (i32, i32) {
    %c0_i32 = arith.constant 0 : i32
    %c0_i32_0 = arith.constant 0 : i32
    %c0_i32_1 = arith.constant 0 : i32
    return %c0_i32, %c0_i32_0 : i32, i32
  }
  func.func @transform_9(%arg0: i32) -> (i32, i32) {
    %c0_i32 = arith.constant 0 : i32
    %c0_i32_0 = arith.constant 0 : i32
    %c0_i32_1 = arith.constant 0 : i32
    return %c0_i32, %c0_i32_0 : i32, i32
  }
  func.func @transform_10(%arg0: i32) -> (i32, i32) {
    %c0_i32 = arith.constant 0 : i32
    %c0_i32_0 = arith.constant 0 : i32
    return %arg0, %c0_i32 : i32, i32
  }
}

module attributes {stable_mosaic.version = 11 : i64} {
  func.func @kernel(%arg0: i32, %arg1: memref<256x16xf32, #tpu.memory_space<vmem>>, %arg2: memref<16x32xbf16, #tpu.memory_space<vmem>>, %arg3: memref<1x32xf32, #tpu.memory_space<vmem>>, %arg4: memref<32x32xbf16, #tpu.memory_space<vmem>>, %arg5: memref<1x32xf32, #tpu.memory_space<vmem>>, %arg6: memref<32x32xbf16, #tpu.memory_space<vmem>>, %arg7: memref<1x32xf32, #tpu.memory_space<vmem>>, %arg8: memref<32x128xbf16, #tpu.memory_space<vmem>>, %arg9: memref<16x128xbf16, #tpu.memory_space<vmem>>, %arg10: memref<1x128xf32, #tpu.memory_space<vmem>>, %arg11: memref<256x128xf32, #tpu.memory_space<vmem>>) attributes {dimension_semantics = [#tpu.dimension_semantics<parallel>], iteration_bounds = array<i64: 1>, scalar_prefetch = 0 : i64, scratch_operands = 0 : i64, tpu.core_type = #tpu.core_type<tc>, window_params = [{transform_indices = @transform_0, window_bounds = array<i64: 256, 16>}, {pipeline_mode = #tpu.pipeline_mode<synchronous>, transform_indices = @transform_1, window_bounds = array<i64: 16, 32>}, {pipeline_mode = #tpu.pipeline_mode<synchronous>, transform_indices = @transform_2, window_bounds = array<i64: 1, 32>}, {pipeline_mode = #tpu.pipeline_mode<synchronous>, transform_indices = @transform_3, window_bounds = array<i64: 32, 32>}, {pipeline_mode = #tpu.pipeline_mode<synchronous>, transform_indices = @transform_4, window_bounds = array<i64: 1, 32>}, {pipeline_mode = #tpu.pipeline_mode<synchronous>, transform_indices = @transform_5, window_bounds = array<i64: 32, 32>}, {pipeline_mode = #tpu.pipeline_mode<synchronous>, transform_indices = @transform_6, window_bounds = array<i64: 1, 32>}, {pipeline_mode = #tpu.pipeline_mode<synchronous>, transform_indices = @transform_7, window_bounds = array<i64: 32, 128>}, {pipeline_mode = #tpu.pipeline_mode<synchronous>, transform_indices = @transform_8, window_bounds = array<i64: 16, 128>}, {pipeline_mode = #tpu.pipeline_mode<synchronous>, transform_indices = @transform_9, window_bounds = array<i64: 1, 128>}, {transform_indices = @transform_10, window_bounds = array<i64: 256, 128>}]} {
    %c0 = arith.constant 0 : index
    %c0_0 = arith.constant 0 : index
    %0 = vector.load %arg1[%c0, %c0_0] : memref<256x16xf32, #tpu.memory_space<vmem>>, vector<256x16xf32>
    %1 = arith.truncf %0 : vector<256x16xf32> to vector<256x16xbf16>
    %c0_1 = arith.constant 0 : index
    %c0_2 = arith.constant 0 : index
    %2 = vector.load %arg2[%c0_1, %c0_2] : memref<16x32xbf16, #tpu.memory_space<vmem>>, vector<16x32xbf16>
    %c0_3 = arith.constant 0 : index
    %c0_4 = arith.constant 0 : index
    %3 = vector.load %arg3[%c0_3, %c0_4] : memref<1x32xf32, #tpu.memory_space<vmem>>, vector<1x32xf32>
    %cst = arith.constant dense<0.000000e+00> : vector<256x32xf32>
    %4 = tpu.matmul %1, %2, %cst {dimension_numbers = #tpu.dot_dimension_numbers<[1], [0], [0], [1], [0, 0, 1, 1], [], []>} : vector<256x16xbf16>, vector<16x32xbf16>, vector<256x32xf32> -> vector<256x32xf32>
    %5 = vector.broadcast %3 : vector<1x32xf32> to vector<256x32xf32>
    %6 = arith.addf %4, %5 : vector<256x32xf32>
    %cst_5 = arith.constant 0.000000e+00 : f32
    %7 = vector.broadcast %cst_5 : f32 to vector<256x32xf32>
    %8 = arith.maximumf %6, %7 : vector<256x32xf32>
    %9 = arith.truncf %8 : vector<256x32xf32> to vector<256x32xbf16>
    %c0_6 = arith.constant 0 : index
    %c0_7 = arith.constant 0 : index
    %10 = vector.load %arg4[%c0_6, %c0_7] : memref<32x32xbf16, #tpu.memory_space<vmem>>, vector<32x32xbf16>
    %c0_8 = arith.constant 0 : index
    %c0_9 = arith.constant 0 : index
    %11 = vector.load %arg5[%c0_8, %c0_9] : memref<1x32xf32, #tpu.memory_space<vmem>>, vector<1x32xf32>
    %cst_10 = arith.constant dense<0.000000e+00> : vector<256x32xf32>
    %12 = tpu.matmul %9, %10, %cst_10 {dimension_numbers = #tpu.dot_dimension_numbers<[1], [0], [0], [1], [0, 0, 1, 1], [], []>} : vector<256x32xbf16>, vector<32x32xbf16>, vector<256x32xf32> -> vector<256x32xf32>
    %13 = vector.broadcast %11 : vector<1x32xf32> to vector<256x32xf32>
    %14 = arith.addf %12, %13 : vector<256x32xf32>
    %cst_11 = arith.constant 0.000000e+00 : f32
    %15 = vector.broadcast %cst_11 : f32 to vector<256x32xf32>
    %16 = arith.maximumf %14, %15 : vector<256x32xf32>
    %17 = arith.truncf %16 : vector<256x32xf32> to vector<256x32xbf16>
    %c0_12 = arith.constant 0 : index
    %c0_13 = arith.constant 0 : index
    %18 = vector.load %arg6[%c0_12, %c0_13] : memref<32x32xbf16, #tpu.memory_space<vmem>>, vector<32x32xbf16>
    %c0_14 = arith.constant 0 : index
    %c0_15 = arith.constant 0 : index
    %19 = vector.load %arg7[%c0_14, %c0_15] : memref<1x32xf32, #tpu.memory_space<vmem>>, vector<1x32xf32>
    %cst_16 = arith.constant dense<0.000000e+00> : vector<256x32xf32>
    %20 = tpu.matmul %17, %18, %cst_16 {dimension_numbers = #tpu.dot_dimension_numbers<[1], [0], [0], [1], [0, 0, 1, 1], [], []>} : vector<256x32xbf16>, vector<32x32xbf16>, vector<256x32xf32> -> vector<256x32xf32>
    %21 = vector.broadcast %19 : vector<1x32xf32> to vector<256x32xf32>
    %22 = arith.addf %20, %21 : vector<256x32xf32>
    %cst_17 = arith.constant 0.000000e+00 : f32
    %23 = vector.broadcast %cst_17 : f32 to vector<256x32xf32>
    %24 = arith.maximumf %22, %23 : vector<256x32xf32>
    %25 = arith.truncf %24 : vector<256x32xf32> to vector<256x32xbf16>
    %c0_18 = arith.constant 0 : index
    %c0_19 = arith.constant 0 : index
    %26 = vector.load %arg8[%c0_18, %c0_19] : memref<32x128xbf16, #tpu.memory_space<vmem>>, vector<32x128xbf16>
    %cst_20 = arith.constant dense<0.000000e+00> : vector<256x128xf32>
    %27 = tpu.matmul %25, %26, %cst_20 {dimension_numbers = #tpu.dot_dimension_numbers<[1], [0], [0], [1], [0, 0, 1, 1], [], []>} : vector<256x32xbf16>, vector<32x128xbf16>, vector<256x128xf32> -> vector<256x128xf32>
    %c0_21 = arith.constant 0 : index
    %c0_22 = arith.constant 0 : index
    %28 = vector.load %arg9[%c0_21, %c0_22] : memref<16x128xbf16, #tpu.memory_space<vmem>>, vector<16x128xbf16>
    %cst_23 = arith.constant dense<0.000000e+00> : vector<256x128xf32>
    %29 = tpu.matmul %1, %28, %cst_23 {dimension_numbers = #tpu.dot_dimension_numbers<[1], [0], [0], [1], [0, 0, 1, 1], [], []>} : vector<256x16xbf16>, vector<16x128xbf16>, vector<256x128xf32> -> vector<256x128xf32>
    %30 = arith.addf %27, %29 : vector<256x128xf32>
    %c0_24 = arith.constant 0 : index
    %c0_25 = arith.constant 0 : index
    %31 = vector.load %arg10[%c0_24, %c0_25] : memref<1x128xf32, #tpu.memory_space<vmem>>, vector<1x128xf32>
    %32 = vector.broadcast %31 : vector<1x128xf32> to vector<256x128xf32>
    %33 = arith.addf %30, %32 : vector<256x128xf32>
    %c0_26 = arith.constant 0 : index
    %c0_27 = arith.constant 0 : index
    %34 = vector.load %arg11[%c0_26, %c0_27] : memref<256x128xf32, #tpu.memory_space<vmem>>, vector<256x128xf32>
    tpu.vector_store %arg11[%c0_26, %c0_27], %33 {strides = array<i32>} : memref<256x128xf32, #tpu.memory_space<vmem>>, vector<256x128xf32>,
    return
  }
  func.func @transform_0(%arg0: i32) -> (i32, i32) {
    %c0_i32 = arith.constant 0 : i32
    %c0_i32_0 = arith.constant 0 : i32
    return %arg0, %c0_i32 : i32, i32
  }
  func.func @transform_1(%arg0: i32) -> (i32, i32) {
    %c0_i32 = arith.constant 0 : i32
    %c0_i32_0 = arith.constant 0 : i32
    %c0_i32_1 = arith.constant 0 : i32
    return %c0_i32, %c0_i32_0 : i32, i32
  }
  func.func @transform_2(%arg0: i32) -> (i32, i32) {
    %c0_i32 = arith.constant 0 : i32
    %c0_i32_0 = arith.constant 0 : i32
    %c0_i32_1 = arith.constant 0 : i32
    return %c0_i32, %c0_i32_0 : i32, i32
  }
  func.func @transform_3(%arg0: i32) -> (i32, i32) {
    %c0_i32 = arith.constant 0 : i32
    %c0_i32_0 = arith.constant 0 : i32
    %c0_i32_1 = arith.constant 0 : i32
    return %c0_i32, %c0_i32_0 : i32, i32
  }
  func.func @transform_4(%arg0: i32) -> (i32, i32) {
    %c0_i32 = arith.constant 0 : i32
    %c0_i32_0 = arith.constant 0 : i32
    %c0_i32_1 = arith.constant 0 : i32
    return %c0_i32, %c0_i32_0 : i32, i32
  }
  func.func @transform_5(%arg0: i32) -> (i32, i32) {
    %c0_i32 = arith.constant 0 : i32
    %c0_i32_0 = arith.constant 0 : i32
    %c0_i32_1 = arith.constant 0 : i32
    return %c0_i32, %c0_i32_0 : i32, i32
  }
  func.func @transform_6(%arg0: i32) -> (i32, i32) {
    %c0_i32 = arith.constant 0 : i32
    %c0_i32_0 = arith.constant 0 : i32
    %c0_i32_1 = arith.constant 0 : i32
    return %c0_i32, %c0_i32_0 : i32, i32
  }
  func.func @transform_7(%arg0: i32) -> (i32, i32) {
    %c0_i32 = arith.constant 0 : i32
    %c0_i32_0 = arith.constant 0 : i32
    %c0_i32_1 = arith.constant 0 : i32
    return %c0_i32, %c0_i32_0 : i32, i32
  }
  func.func @transform_8(%arg0: i32) -> (i32, i32) {
    %c0_i32 = arith.constant 0 : i32
    %c0_i32_0 = arith.constant 0 : i32
    %c0_i32_1 = arith.constant 0 : i32
    return %c0_i32, %c0_i32_0 : i32, i32
  }
  func.func @transform_9(%arg0: i32) -> (i32, i32) {
    %c0_i32 = arith.constant 0 : i32
    %c0_i32_0 = arith.constant 0 : i32
    %c0_i32_1 = arith.constant 0 : i32
    return %c0_i32, %c0_i32_0 : i32, i32
  }
  func.func @transform_10(%arg0: i32) -> (i32, i32) {
    %c0_i32 = arith.constant 0 : i32
    %c0_i32_0 = arith.constant 0 : i32
    return %arg0, %c0_i32 : i32, i32
  }
}

</mosaic_0001>

<bundles_post_ra>
// kernel: tpu_custom_call.1
= control target key start
LH: loop header
LB: loop body
LE: loop exit
PB: predicated region body
PF: predicated region fallthrough
CT: control target
= control target key end

     0   :  { %vm100_vm0 = vcmask 130048   ;;  %s2309_s0 = inlined_call_operand.vmem [shape: f32[256,16], index: 0, kind: input, shape index: {}]   ;;  %s2310_s1 = inlined_call_operand.vmem [shape: bf16[16,32], index: 1, kind: input, shape index: {}]   ;;  %s2311_s2 = inlined_call_operand.vmem [shape: f32[1,32], index: 2, kind: input, shape index: {}]   ;;  %s2312_s3 = inlined_call_operand.vmem [shape: bf16[32,32], index: 3, kind: input, shape index: {}]   ;;  %s2313_s4 = inlined_call_operand.vmem [shape: f32[1,32], index: 4, kind: input, shape index: {}]   ;;  %s2314_s5 = inlined_call_operand.vmem [shape: bf16[32,32], index: 5, kind: input, shape index: {}]   ;;  %s2315_s6 = inlined_call_operand.vmem [shape: f32[1,32], index: 6, kind: input, shape index: {}]   ;;  %s2316_s7 = inlined_call_operand.vmem [shape: bf16[32,128], index: 7, kind: input, shape index: {}]   ;;  %s2317_s8 = inlined_call_operand.vmem [shape: bf16[16,128], index: 8, kind: input, shape index: {}]   ;;  %s2318_s9 = inlined_call_operand.vmem [shape: f32[1,128], index: 9, kind: input, shape index: {}]   ;;  %s2319_s10 = inlined_call_operand.hbm [shape: f32[256,128], index: 10, kind: output, shape index: {}]  }
   0x1   :  { %v1795_v0 = vld [vmem:[%s2310_s1] sm:$0xff]   ;;  %v38_v2 = vld [vmem:[%s2309_s0 + $0x8] sm:$0xff]  ;;  %v39_v3 = vld [vmem:[%s2309_s0 + $0x10] sm:$0xff] }
   0x2   :  { %v37_v1 = vld [vmem:[%s2309_s0] sm:$0xff]  ;;  %1580 = vmatprep.subr.bf16.mxu0 %v1795_v0  ;;  %v40_v5 = vld [vmem:[%s2309_s0 + $0x18] sm:$0xff]  ;;  %v42_v7 = vld [vmem:[%s2309_s0 + $0x28] sm:$0xff] }
   0x3   :  { %v1897_v4 = vpack.c.bf16 %v38_v2, %v37_v1  ;;  %v41_v6 = vld [vmem:[%s2309_s0 + $0x20] sm:$0xff]  ;;  %1581 = vmatpush3.bf16.msra.mxu0 %v1795_v0  ;;  %v1908_v8 = vpack.c.bf16 %v40_v5, %v39_v3  ;;  %v43_v10 = vld [vmem:[%s2309_s0 + $0x30] sm:$0xff]  ;;  %v44_v11 = vld [vmem:[%s2309_s0 + $0x38] sm:$0xff] }
   0x4   :  { %v1910_v9 = vpack.c.bf16 %v42_v7, %v41_v6  ;;  %v45_v12 = vld [vmem:[%s2309_s0 + $0x40] sm:$0xff]  ;;  %v46_v13 = vld [vmem:[%s2309_s0 + $0x48] sm:$0xff]  ;;  %v1930_v14 = vpack.c.bf16 %v44_v11, %v43_v10  ;;  %v47_v17 = vld [vmem:[%s2309_s0 + $0x50] sm:$0xff] }
   0x5   :  { %1582 = vmatprep.mubr.msk.bf16.mxu0 %vm100_vm0, %v1897_v4  ;;  %v1932_v15 = vpack.c.bf16 %v46_v13, %v45_v12  ;;  %v1796_v16 = vld [vmem:[%s2312_s3] sm:$0xff]   ;;  %v48_v18 = vld [vmem:[%s2309_s0 + $0x58] sm:$0xff]  ;;  %v1797_v19 = vld [vmem:[%s2312_s3 + $0x8] sm:$0xff]  }
   0x6   :  { %1583 = vmatmul.mubr.msk.bf16.vlgmr.msra.gmra.mrb[0].mxu0 %vm100_vm0, %v1908_v8  ;;  %v49_v20 = vld [vmem:[%s2309_s0 + $0x60] sm:$0xff]  ;;  %v50_v21 = vld [vmem:[%s2309_s0 + $0x68] sm:$0xff]  ;;  %1614 = vmatprep.subr.bf16.mxu0 %v1796_v16 }
   0x7   :  { %1586 = vmatprep.mubr.msk.bf16.mxu0 %vm100_vm0, %v1910_v9  ;;  %1615 = vmatpush3.bf16.msra.mxu0 %v1796_v16 }
   0x8   :  { %1616 = vmatprep.subr.bf16.mxu0 %v1797_v19  ;;  %1756 = vmatprep.subr.bf16.mxu1 %v1796_v16 }
   0x9   :  { %1758 = vmatpush3.bf16.msra.mxu1 %v1796_v16 }
   0xe   :  { %1587 = vmatmul.mubr.msk.bf16.gmra.mrb[4].mxu0 %vm100_vm0, %v1930_v14 }
   0xf   :  { %1590 = vmatprep.mubr.msk.bf16.mxu0 %vm100_vm0, %v1932_v15 }
  0x10   :  { %15 = vsyncpa [#allocation3], 0  ;;  %v1956_v22 = vpack.c.bf16 %v48_v18, %v47_v17  ;;  %1757 = vmatprep.subr.bf16.mxu1 %v1797_v19  ;;  %v1958_v23 = vpack.c.bf16 %v50_v21, %v49_v20  ;;  %1617 = vmatpush3.bf16.msra.mxu0 %v1797_v19  ;;  %v51_v24 = vld [vmem:[%s2309_s0 + $0x70] sm:$0xff]  ;;  %v52_v25 = vld [vmem:[%s2309_s0 + $0x78] sm:$0xff]  ;;  %vm381_vm1 = vcmask 261120  }
  0x11   :  { %1759 = vmatpush3.bf16.msra.mxu1 %v1797_v19  ;;  %v53_v26 = vld [vmem:[%s2309_s0 + $0x80] sm:$0xff]  ;;  %v54_v27 = vld [vmem:[%s2309_s0 + $0x88] sm:$0xff]  ;;  %v1976_v28 = vpack.c.bf16 %v52_v25, %v51_v24  ;;  %v55_v30 = vld [vmem:[%s2309_s0 + $0x90] sm:$0xff] }
  0x12   :  { %v1978_v29 = vpack.c.bf16 %v54_v27, %v53_v26  ;;  %v56_v31 = vld [vmem:[%s2309_s0 + $0x98] sm:$0xff]  ;;  %v57_v32 = vld [vmem:[%s2309_s0 + $0xa0] sm:$0xff]  ;;  %v58_v33 = vld [vmem:[%s2309_s0 + $0xa8] sm:$0xff] }
  0x13   :  { %v1996_v34 = vpack.c.bf16 %v56_v31, %v55_v30  ;;  %v1998_v35 = vpack.c.bf16 %v58_v33, %v57_v32  ;;  %v59_v36 = vld [vmem:[%s2309_s0 + $0xb0] sm:$0xff]  ;;  %v60_v37 = vld [vmem:[%s2309_s0 + $0xb8] sm:$0xff]  ;;  %v61_v38 = vld [vmem:[%s2309_s0 + $0xc0] sm:$0xff] }
  0x14   :  { %v62_v39 = vld [vmem:[%s2309_s0 + $0xc8] sm:$0xff]  ;;  %v2016_v40 = vpack.c.bf16 %v60_v37, %v59_v36  ;;  %v63_v42 = vld [vmem:[%s2309_s0 + $0xd0] sm:$0xff]  ;;  %v64_v43 = vld [vmem:[%s2309_s0 + $0xd8] sm:$0xff] }
  0x15   :  { %v2018_v41 = vpack.c.bf16 %v62_v39, %v61_v38  ;;  %v65_v44 = vld [vmem:[%s2309_s0 + $0xe0] sm:$0xff]  ;;  %v66_v45 = vld [vmem:[%s2309_s0 + $0xe8] sm:$0xff]  ;;  %v2036_v46 = vpack.c.bf16 %v64_v43, %v63_v42  ;;  %v67_v48 = vld [vmem:[%s2309_s0 + $0xf0] sm:$0xff] }
  0x16   :  { %1591 = vmatmul.mubr.msk.bf16.gmra.mrb[8].mxu0 %vm100_vm0, %v1956_v22  ;;  %v2038_v47 = vpack.c.bf16 %v66_v45, %v65_v44  ;;  %v68_v49 = vld [vmem:[%s2309_s0 + $0xf8] sm:$0xff]  ;;  %v1798_v51 = vld [vmem:[%s2314_s5] sm:$0xff]   ;;  %v1799_v7 = vld [vmem:[%s2314_s5 + $0x8] sm:$0xff]  }
  0x17   :  { %1594 = vmatprep.mubr.msk.bf16.mxu0 %vm100_vm0, %v1958_v23  ;;  %v2050_v50 = vpack.c.bf16 %v68_v49, %v67_v48  ;;  %1650 = vmatprep.subr.bf16.mxu0 %v1798_v51  ;;  %v2060_v52 = vld [vmem:[%s2311_s2] ss:$0 sm:$0xff] }
  0x1e   :  { %1595 = vmatmul.mubr.msk.bf16.gmra.mrb[12].mxu0 %vm100_vm0, %v1976_v28 }
  0x1f   :  { %1598 = vmatprep.mubr.msk.bf16.mxu0 %vm100_vm0, %v1978_v29 }
  0x26   :  { %1599 = vmatmul.mubr.msk.bf16.gmra.mrb[16].mxu0 %vm100_vm0, %v1996_v34 }
  0x27   :  { %1602 = vmatprep.mubr.msk.bf16.mxu0 %vm100_vm0, %v1998_v35 }
  0x2e   :  { %1603 = vmatmul.mubr.msk.bf16.gmra.mrb[20].mxu0 %vm100_vm0, %v2016_v40 }
  0x2f   :  { %1606 = vmatprep.mubr.msk.bf16.mxu0 %vm100_vm0, %v2018_v41 }
  0x36   :  { %1607 = vmatmul.mubr.msk.bf16.gmra.mrb[24].mxu0 %vm100_vm0, %v2036_v46 }
  0x37   :  { %1610 = vmatprep.mubr.msk.bf16.mxu0 %vm100_vm0, %v2038_v47 }
  0x3e   :  { %1611 = vmatmul.mubr.msk.bf16.gmra.mrb[28].mxu0 %vm100_vm0, %v2050_v50 }
  0xd9   :  { %v1584_v53 = vpop.f32.mrb[0].mxu0 }
  0xda   :  { %v192_v54 = vadd.f32 %v1584_v53, %v2060_v52  ;;  %v183_v55 = vpop.f32.mrb[1].mxu0 }
  0xdb   :  { %v184_v56 = vadd.f32 %v2060_v52, %v183_v55  ;;  %v1585_v57 = vpop.f32.mrb[2].mxu0 }
  0xdc   :  { %v195_v58 = vadd.f32 %v1585_v57, %v2060_v52  ;;  %v186_v59 = vpop.f32.mrb[3].mxu0  ;;  %v312_v61 = vmax.f32 %v192_v54, 0.0 }
  0xdd   :  { %v187_v60 = vadd.f32 %v2060_v52, %v186_v59  ;;  %v310_v63 = vmax.f32 %v184_v56, 0.0 }
  0xde   :  { %v313_v62 = vmax.f32 %v195_v58, 0.0 }
  0xdf   :  { %v311_v0 = vmax.f32 %v187_v60, 0.0 }
  0xe0   :  { %v343_v1 = vpack.c.bf16 %v313_v62, %v312_v61 }
  0xe1   :  { %v342_v2 = vpack.c.bf16 %v311_v0, %v310_v63  ;;  %v1588_v3 = vpop.f32.mrb[4].mxu0 }
  0xe2   :  { %v208_v5 = vadd.f32 %v1588_v3, %v2060_v52  ;;  %v199_v6 = vpop.f32.mrb[5].mxu0 }
  0xe3   :  { %v200_v10 = vadd.f32 %v2060_v52, %v199_v6  ;;  %v1589_v11 = vpop.f32.mrb[6].mxu0  ;;  %1618 = vmatprep.mubr.msk.bf16.mxu0 %vm381_vm1, %v342_v2 }
  0xe4   :  { %v211_v12 = vadd.f32 %v1589_v11, %v2060_v52  ;;  %v202_v13 = vpop.f32.mrb[7].mxu0  ;;  %1619 = vmatmul.mubr.msk.bf16.vlgmr.msra.gmra.mrb[32].mxu0 %vm381_vm1, %v343_v1  ;;  %v316_v17 = vmax.f32 %v208_v5, 0.0 }
  0xe5   :  { %v203_v16 = vadd.f32 %v2060_v52, %v202_v13  ;;  %1651 = vmatpush3.bf16.msra.mxu0 %v1798_v51  ;;  %v314_v19 = vmax.f32 %v200_v10, 0.0 }
  0xe6   :  { %v317_v18 = vmax.f32 %v211_v12, 0.0  ;;  %1652 = vmatprep.subr.bf16.mxu0 %v1799_v7 }
  0xe7   :  { %v315_v20 = vmax.f32 %v203_v16, 0.0 }
  0xe8   :  { %v345_v21 = vpack.c.bf16 %v317_v18, %v316_v17 }
  0xe9   :  { %v344_v24 = vpack.c.bf16 %v315_v20, %v314_v19  ;;  %v1592_v25 = vpop.f32.mrb[8].mxu0  ;;  %1653 = vmatpush3.bf16.msra.mxu0 %v1799_v7 }
  0xea   :  { %v224_v26 = vadd.f32 %v1592_v25, %v2060_v52  ;;  %v215_v27 = vpop.f32.mrb[9].mxu0 }
  0xeb   :  { %v216_v30 = vadd.f32 %v2060_v52, %v215_v27  ;;  %v1593_v31 = vpop.f32.mrb[10].mxu0  ;;  %1622 = vmatprep.mubr.msk.bf16.mxu0 %vm381_vm1, %v344_v24 }
  0xec   :  { %v227_v32 = vadd.f32 %v1593_v31, %v2060_v52  ;;  %v218_v33 = vpop.f32.mrb[11].mxu0  ;;  %1623 = vmatmul.mubr.msk.bf16.gmra.mrb[36].mxu0 %vm381_vm1, %v345_v21  ;;  %v320_v37 = vmax.f32 %v224_v26, 0.0 }
  0xed   :  { %v219_v36 = vadd.f32 %v2060_v52, %v218_v33  ;;  %v318_v39 = vmax.f32 %v216_v30, 0.0 }
  0xee   :  { %v321_v38 = vmax.f32 %v227_v32, 0.0 }
  0xef   :  { %v319_v42 = vmax.f32 %v219_v36, 0.0 }
  0xf0   :  { %v347_v43 = vpack.c.bf16 %v321_v38, %v320_v37 }
  0xf1   :  { %v346_v44 = vpack.c.bf16 %v319_v42, %v318_v39  ;;  %v1596_v45 = vpop.f32.mrb[12].mxu0 }
  0xf2   :  { %v240_v48 = vadd.f32 %v1596_v45, %v2060_v52  ;;  %v231_v49 = vpop.f32.mrb[13].mxu0 }
  0xf3   :  { %v232_v51 = vadd.f32 %v2060_v52, %v231_v49  ;;  %v1597_v53 = vpop.f32.mrb[14].mxu0  ;;  %1626 = vmatprep.mubr.msk.bf16.mxu0 %vm381_vm1, %v346_v44 }
  0xf4   :  { %v243_v54 = vadd.f32 %v1597_v53, %v2060_v52  ;;  %v234_v55 = vpop.f32.mrb[15].mxu0  ;;  %1627 = vmatmul.mubr.msk.bf16.gmra.mrb[40].mxu0 %vm381_vm1, %v347_v43  ;;  %v324_v57 = vmax.f32 %v240_v48, 0.0 }
  0xf5   :  { %v235_v56 = vadd.f32 %v2060_v52, %v234_v55  ;;  %v322_v59 = vmax.f32 %v232_v51, 0.0 }
  0xf6   :  { %v325_v58 = vmax.f32 %v243_v54, 0.0 }
  0xf7   :  { %v323_v60 = vmax.f32 %v235_v56, 0.0 }
  0xf8   :  { %v349_v61 = vpack.c.bf16 %v325_v58, %v324_v57 }
  0xf9   :  { %v348_v62 = vpack.c.bf16 %v323_v60, %v322_v59  ;;  %v1600_v63 = vpop.f32.mrb[16].mxu0 }
  0xfa   :  { %v256_v0 = vadd.f32 %v1600_v63, %v2060_v52  ;;  %v247_v1 = vpop.f32.mrb[17].mxu0 }
  0xfb   :  { %v248_v2 = vadd.f32 %v2060_v52, %v247_v1  ;;  %v1601_v3 = vpop.f32.mrb[18].mxu0  ;;  %1630 = vmatprep.mubr.msk.bf16.mxu0 %vm381_vm1, %v348_v62 }
  0xfc   :  { %v259_v5 = vadd.f32 %v1601_v3, %v2060_v52  ;;  %v250_v6 = vpop.f32.mrb[19].mxu0  ;;  %1631 = vmatmul.mubr.msk.bf16.gmra.mrb[44].mxu0 %vm381_vm1, %v349_v61  ;;  %v328_v10 = vmax.f32 %v256_v0, 0.0 }
  0xfd   :  { %v251_v7 = vadd.f32 %v2060_v52, %v250_v6  ;;  %v326_v12 = vmax.f32 %v248_v2, 0.0 }
  0xfe   :  { %v329_v11 = vmax.f32 %v259_v5, 0.0 }
  0xff   :  { %v327_v13 = vmax.f32 %v251_v7, 0.0 }
 0x100   :  { %v351_v16 = vpack.c.bf16 %v329_v11, %v328_v10  ;;  %v1800_v11 = vld [vmem:[%s2317_s8] sm:$0xff]  }
 0x101   :  { %v1604_v17 = vpop.f32.mrb[20].mxu0  ;;  %v350_v18 = vpack.c.bf16 %v327_v13, %v326_v12  ;;  %1686 = vmatprep.subr.bf16.mxu1 %v1800_v11  ;;  %v1802_v12 = vld [vmem:[%s2316_s7 + $0x8] sm:$0xff]  }
 0x102   :  { %v272_v19 = vadd.f32 %v1604_v17, %v2060_v52  ;;  %v263_v20 = vpop.f32.mrb[21].mxu0 }
 0x103   :  { %v264_v21 = vadd.f32 %v2060_v52, %v263_v20  ;;  %v1605_v24 = vpop.f32.mrb[22].mxu0  ;;  %1634 = vmatprep.mubr.msk.bf16.mxu1 %vm381_vm1, %v350_v18 }
 0x104   :  { %v275_v25 = vadd.f32 %v1605_v24, %v2060_v52  ;;  %v266_v26 = vpop.f32.mrb[23].mxu0  ;;  %1635 = vmatmul.mubr.msk.bf16.vlgmr.msra.gmra.mrb[0].mxu1 %vm381_vm1, %v351_v16  ;;  %v332_v30 = vmax.f32 %v272_v19, 0.0 }
 0x105   :  { %v267_v27 = vadd.f32 %v2060_v52, %v266_v26  ;;  %v330_v32 = vmax.f32 %v264_v21, 0.0  ;;  %1687 = vmatpush3.bf16.msra.mxu1 %v1800_v11 }
 0x106   :  { %v333_v31 = vmax.f32 %v275_v25, 0.0 }
 0x107   :  { %v331_v33 = vmax.f32 %v267_v27, 0.0 }
 0x108   :  { %v353_v36 = vpack.c.bf16 %v333_v31, %v332_v30 }
 0x109   :  { %v352_v37 = vpack.c.bf16 %v331_v33, %v330_v32  ;;  %v1608_v38 = vpop.f32.mrb[24].mxu0 }
 0x10a   :  { %v288_v39 = vadd.f32 %v1608_v38, %v2060_v52  ;;  %v279_v42 = vpop.f32.mrb[25].mxu0 }
 0x10b   :  { %v280_v43 = vadd.f32 %v2060_v52, %v279_v42  ;;  %v1609_v44 = vpop.f32.mrb[26].mxu0  ;;  %1638 = vmatprep.mubr.msk.bf16.mxu1 %vm381_vm1, %v352_v37 }
 0x10c   :  { %v291_v45 = vadd.f32 %v1609_v44, %v2060_v52  ;;  %v282_v48 = vpop.f32.mrb[27].mxu0  ;;  %1639 = vmatmul.mubr.msk.bf16.gmra.mrb[4].mxu1 %vm381_vm1, %v353_v36  ;;  %v336_v51 = vmax.f32 %v288_v39, 0.0 }
 0x10d   :  { %v283_v49 = vadd.f32 %v2060_v52, %v282_v48  ;;  %v334_v54 = vmax.f32 %v280_v43, 0.0 }
 0x10e   :  { %v337_v53 = vmax.f32 %v291_v45, 0.0 }
 0x10f   :  { %v335_v55 = vmax.f32 %v283_v49, 0.0 }
 0x110   :  { %v355_v56 = vpack.c.bf16 %v337_v53, %v336_v51 }
 0x111   :  { %v354_v57 = vpack.c.bf16 %v335_v55, %v334_v54  ;;  %v1612_v58 = vpop.f32.mrb[28].mxu0 }
 0x112   :  { %v304_v59 = vadd.f32 %v1612_v58, %v2060_v52  ;;  %v295_v60 = vpop.f32.mrb[29].mxu0 }
 0x113   :  { %v296_v61 = vadd.f32 %v2060_v52, %v295_v60  ;;  %v1613_v62 = vpop.f32.mrb[30].mxu0  ;;  %1642 = vmatprep.mubr.msk.bf16.mxu1 %vm381_vm1, %v354_v57 }
 0x114   :  { %v307_v63 = vadd.f32 %v1613_v62, %v2060_v52  ;;  %v298_v0 = vpop.f32.mrb[31].mxu0  ;;  %1643 = vmatmul.mubr.msk.bf16.gmra.mrb[8].mxu1 %vm381_vm1, %v355_v56  ;;  %v340_v2 = vmax.f32 %v304_v59, 0.0 }
 0x115   :  { %v299_v1 = vadd.f32 %v2060_v52, %v298_v0  ;;  %v338_v5 = vmax.f32 %v296_v61, 0.0  ;;  %v1801_v52 = vld [vmem:[%s2316_s7] sm:$0xff]  }
 0x116   :  { %v341_v3 = vmax.f32 %v307_v63, 0.0  ;;  %1720 = vmatprep.subr.bf16.mxu1 %v1801_v52 }
 0x117   :  { %v339_v6 = vmax.f32 %v299_v1, 0.0 }
 0x118   :  { %v357_v7 = vpack.c.bf16 %v341_v3, %v340_v2 }
 0x119   :  { %v356_v10 = vpack.c.bf16 %v339_v6, %v338_v5 }
 0x11b   :  { %1646 = vmatprep.mubr.msk.bf16.mxu1 %vm381_vm1, %v356_v10 }
 0x11c   :  { %1647 = vmatmul.mubr.msk.bf16.gmra.mrb[12].mxu1 %vm381_vm1, %v357_v7 }
 0x11d   :  { %1688 = vmatprep.mubr.msk.bf16.mxu1 %vm100_vm0, %v1897_v4  ;;  %v2155_v4 = vld [vmem:[%s2313_s4] ss:$0 sm:$0xff] }
 0x124   :  { %1689 = vmatmul.mubr.msk.bf16.vlgmr.msra.gmra.mrb[16].mxu1 %vm100_vm0, %v1908_v8 }
 0x125   :  { %1721 = vmatpush3.bf16.msra.mxu1 %v1801_v52  ;;  %1692 = vmatprep.mubr.msk.bf16.mxu1 %vm100_vm0, %v1910_v9 }
 0x126   :  { %1722 = vmatprep.subr.bf16.mxu1 %v1802_v12 }
 0x129   :  { %1723 = vmatpush3.bf16.msra.mxu1 %v1802_v12 }
 0x12c   :  { %1693 = vmatmul.mubr.msk.bf16.gmra.mrb[20].mxu1 %vm100_vm0, %v1930_v14 }
 0x12d   :  { %1696 = vmatprep.mubr.msk.bf16.mxu1 %vm100_vm0, %v1932_v15 }
 0x134   :  { %1697 = vmatmul.mubr.msk.bf16.gmra.mrb[24].mxu1 %vm100_vm0, %v1956_v22 }
 0x135   :  { %1700 = vmatprep.mubr.msk.bf16.mxu1 %vm100_vm0, %v1958_v23 }
 0x13c   :  { %1701 = vmatmul.mubr.msk.bf16.gmra.mrb[28].mxu1 %vm100_vm0, %v1976_v28 }
 0x13d   :  { %1704 = vmatprep.mubr.msk.bf16.mxu1 %vm100_vm0, %v1978_v29 }
 0x144   :  { %1705 = vmatmul.mubr.msk.bf16.gmra.mrb[32].mxu1 %vm100_vm0, %v1996_v34 }
 0x145   :  { %1708 = vmatprep.mubr.msk.bf16.mxu1 %vm100_vm0, %v1998_v35 }
 0x14c   :  { %1709 = vmatmul.mubr.msk.bf16.gmra.mrb[36].mxu1 %vm100_vm0, %v2016_v40 }
 0x14d   :  { %1712 = vmatprep.mubr.msk.bf16.mxu1 %vm100_vm0, %v2018_v41 }
 0x154   :  { %1713 = vmatmul.mubr.msk.bf16.gmra.mrb[40].mxu1 %vm100_vm0, %v2036_v46 }
 0x155   :  { %1716 = vmatprep.mubr.msk.bf16.mxu1 %vm100_vm0, %v2038_v47 }
 0x15c   :  { %1717 = vmatmul.mubr.msk.bf16.gmra.mrb[44].mxu1 %vm100_vm0, %v2050_v50 }
 0x1b7   :  { %v1620_v8 = vpop.f32.mrb[32].mxu0 }
 0x1b8   :  { %v473_v9 = vadd.f32 %v1620_v8, %v2155_v4  ;;  %v464_v14 = vpop.f32.mrb[33].mxu0 }
 0x1b9   :  { %v465_v15 = vadd.f32 %v2155_v4, %v464_v14  ;;  %v1621_v22 = vpop.f32.mrb[34].mxu0 }
 0x1ba   :  { %v476_v23 = vadd.f32 %v1621_v22, %v2155_v4  ;;  %v467_v28 = vpop.f32.mrb[35].mxu0  ;;  %v593_v34 = vmax.f32 %v473_v9, 0.0 }
 0x1bb   :  { %v468_v29 = vadd.f32 %v2155_v4, %v467_v28  ;;  %v591_v40 = vmax.f32 %v465_v15, 0.0 }
 0x1bc   :  { %v594_v35 = vmax.f32 %v476_v23, 0.0 }
 0x1bd   :  { %v592_v41 = vmax.f32 %v468_v29, 0.0 }
 0x1be   :  { %v624_v46 = vpack.c.bf16 %v594_v35, %v593_v34 }
 0x1bf   :  { %v623_v47 = vpack.c.bf16 %v592_v41, %v591_v40  ;;  %v1624_v13 = vpop.f32.mrb[36].mxu0 }
 0x1c0   :  { %v489_v16 = vadd.f32 %v1624_v13, %v2155_v4  ;;  %v480_v17 = vpop.f32.mrb[37].mxu0 }
 0x1c1   :  { %v481_v50 = vadd.f32 %v2155_v4, %v480_v17  ;;  %v1625_v18 = vpop.f32.mrb[38].mxu0  ;;  %1654 = vmatprep.mubr.msk.bf16.mxu0 %vm381_vm1, %v623_v47 }
 0x1c2   :  { %v492_v19 = vadd.f32 %v1625_v18, %v2155_v4  ;;  %v483_v20 = vpop.f32.mrb[39].mxu0  ;;  %1655 = vmatmul.mubr.msk.bf16.vlgmr.msra.gmra.mrb[48].mxu0 %vm381_vm1, %v624_v46  ;;  %v597_v24 = vmax.f32 %v489_v16, 0.0 }
 0x1c3   :  { %v484_v21 = vadd.f32 %v2155_v4, %v483_v20  ;;  %v595_v26 = vmax.f32 %v481_v50, 0.0 }
 0x1c4   :  { %v598_v25 = vmax.f32 %v492_v19, 0.0 }
 0x1c5   :  { %v596_v27 = vmax.f32 %v484_v21, 0.0 }
 0x1c6   :  { %v626_v30 = vpack.c.bf16 %v598_v25, %v597_v24 }
 0x1c7   :  { %v625_v31 = vpack.c.bf16 %v596_v27, %v595_v26  ;;  %v1628_v32 = vpop.f32.mrb[40].mxu0 }
 0x1c8   :  { %v505_v33 = vadd.f32 %v1628_v32, %v2155_v4  ;;  %v496_v36 = vpop.f32.mrb[41].mxu0 }
 0x1c9   :  { %v497_v37 = vadd.f32 %v2155_v4, %v496_v36  ;;  %v1629_v38 = vpop.f32.mrb[42].mxu0  ;;  %1658 = vmatprep.mubr.msk.bf16.mxu0 %vm381_vm1, %v625_v31 }
 0x1ca   :  { %v508_v39 = vadd.f32 %v1629_v38, %v2155_v4  ;;  %v499_v42 = vpop.f32.mrb[43].mxu0  ;;  %1659 = vmatmul.mubr.msk.bf16.gmra.mrb[52].mxu0 %vm381_vm1, %v626_v30  ;;  %v601_v44 = vmax.f32 %v505_v33, 0.0 }
 0x1cb   :  { %v500_v43 = vadd.f32 %v2155_v4, %v499_v42  ;;  %v599_v48 = vmax.f32 %v497_v37, 0.0 }
 0x1cc   :  { %v602_v45 = vmax.f32 %v508_v39, 0.0 }
 0x1cd   :  { %v600_v49 = vmax.f32 %v500_v43, 0.0 }
 0x1ce   :  { %v628_v51 = vpack.c.bf16 %v602_v45, %v601_v44 }
 0x1cf   :  { %v627_v53 = vpack.c.bf16 %v600_v49, %v599_v48  ;;  %v1632_v54 = vpop.f32.mrb[44].mxu0 }
 0x1d0   :  { %v521_v55 = vadd.f32 %v1632_v54, %v2155_v4  ;;  %v512_v56 = vpop.f32.mrb[45].mxu0 }
 0x1d1   :  { %v513_v57 = vadd.f32 %v2155_v4, %v512_v56  ;;  %v1633_v58 = vpop.f32.mrb[46].mxu0  ;;  %1662 = vmatprep.mubr.msk.bf16.mxu0 %vm381_vm1, %v627_v53 }
 0x1d2   :  { %v524_v59 = vadd.f32 %v1633_v58, %v2155_v4  ;;  %v515_v60 = vpop.f32.mrb[47].mxu0  ;;  %1663 = vmatmul.mubr.msk.bf16.gmra.mrb[56].mxu0 %vm381_vm1, %v628_v51  ;;  %v605_v62 = vmax.f32 %v521_v55, 0.0 }
 0x1d3   :  { %v516_v61 = vadd.f32 %v2155_v4, %v515_v60  ;;  %v603_v0 = vmax.f32 %v513_v57, 0.0 }
 0x1d4   :  { %v606_v63 = vmax.f32 %v524_v59, 0.0 }
 0x1d5   :  { %v604_v1 = vmax.f32 %v516_v61, 0.0  ;;  %v2210_v61 = vld [vmem:[%s2315_s6] ss:$0 sm:$0xff] }
 0x1d6   :  { %v630_v2 = vpack.c.bf16 %v606_v63, %v605_v62 }
 0x1d7   :  { %v629_v3 = vpack.c.bf16 %v604_v1, %v603_v0  ;;  %v1636_v5 = vpop.f32.mrb[0].mxu1 }
 0x1d8   :  { %v537_v6 = vadd.f32 %v1636_v5, %v2155_v4  ;;  %v528_v7 = vpop.f32.mrb[1].mxu1 }
 0x1d9   :  { %v529_v10 = vadd.f32 %v2155_v4, %v528_v7  ;;  %v1637_v11 = vpop.f32.mrb[2].mxu1  ;;  %1666 = vmatprep.mubr.msk.bf16.mxu0 %vm381_vm1, %v629_v3 }
 0x1da   :  { %v540_v52 = vadd.f32 %v1637_v11, %v2155_v4  ;;  %v531_v12 = vpop.f32.mrb[3].mxu1  ;;  %1667 = vmatmul.mubr.msk.bf16.gmra.mrb[60].mxu0 %vm381_vm1, %v630_v2  ;;  %v609_v9 = vmax.f32 %v537_v6, 0.0 }
 0x1db   :  { %v532_v8 = vadd.f32 %v2155_v4, %v531_v12  ;;  %v607_v15 = vmax.f32 %v529_v10, 0.0 }
 0x1dc   :  { %v610_v14 = vmax.f32 %v540_v52, 0.0 }
 0x1dd   :  { %v608_v22 = vmax.f32 %v532_v8, 0.0 }
 0x1de   :  { %v632_v23 = vpack.c.bf16 %v610_v14, %v609_v9 }
 0x1df   :  { %v631_v28 = vpack.c.bf16 %v608_v22, %v607_v15  ;;  %v1640_v29 = vpop.f32.mrb[4].mxu1 }
 0x1e0   :  { %v553_v34 = vadd.f32 %v1640_v29, %v2155_v4  ;;  %v544_v35 = vpop.f32.mrb[5].mxu1 }
 0x1e1   :  { %v545_v40 = vadd.f32 %v2155_v4, %v544_v35  ;;  %v1641_v41 = vpop.f32.mrb[6].mxu1  ;;  %1670 = vmatprep.mubr.msk.bf16.mxu0 %vm381_vm1, %v631_v28 }
 0x1e2   :  { %v556_v46 = vadd.f32 %v1641_v41, %v2155_v4  ;;  %v547_v47 = vpop.f32.mrb[7].mxu1  ;;  %1671 = vmatmul.mubr.msk.bf16.gmra.mrb[64].mxu0 %vm381_vm1, %v632_v23  ;;  %v613_v16 = vmax.f32 %v553_v34, 0.0 }
 0x1e3   :  { %v548_v13 = vadd.f32 %v2155_v4, %v547_v47  ;;  %v611_v50 = vmax.f32 %v545_v40, 0.0 }
 0x1e4   :  { %v614_v17 = vmax.f32 %v556_v46, 0.0 }
 0x1e5   :  { %v612_v18 = vmax.f32 %v548_v13, 0.0 }
 0x1e6   :  { %v634_v19 = vpack.c.bf16 %v614_v17, %v613_v16 }
 0x1e7   :  { %v633_v20 = vpack.c.bf16 %v612_v18, %v611_v50  ;;  %v1644_v21 = vpop.f32.mrb[8].mxu1 }
 0x1e8   :  { %v569_v24 = vadd.f32 %v1644_v21, %v2155_v4  ;;  %v560_v25 = vpop.f32.mrb[9].mxu1 }
 0x1e9   :  { %v561_v26 = vadd.f32 %v2155_v4, %v560_v25  ;;  %v1645_v27 = vpop.f32.mrb[10].mxu1  ;;  %1674 = vmatprep.mubr.msk.bf16.mxu0 %vm381_vm1, %v633_v20 }
 0x1ea   :  { %v572_v30 = vadd.f32 %v1645_v27, %v2155_v4  ;;  %v563_v31 = vpop.f32.mrb[11].mxu1  ;;  %1675 = vmatmul.mubr.msk.bf16.gmra.mrb[68].mxu0 %vm381_vm1, %v634_v19  ;;  %v617_v33 = vmax.f32 %v569_v24, 0.0 }
 0x1eb   :  { %v564_v32 = vadd.f32 %v2155_v4, %v563_v31  ;;  %v615_v37 = vmax.f32 %v561_v26, 0.0 }
 0x1ec   :  { %v618_v36 = vmax.f32 %v572_v30, 0.0 }
 0x1ed   :  { %v616_v38 = vmax.f32 %v564_v32, 0.0 }
 0x1ee   :  { %v636_v39 = vpack.c.bf16 %v618_v36, %v617_v33 }
 0x1ef   :  { %v635_v42 = vpack.c.bf16 %v616_v38, %v615_v37  ;;  %v1648_v43 = vpop.f32.mrb[12].mxu1 }
 0x1f0   :  { %v585_v44 = vadd.f32 %v1648_v43, %v2155_v4  ;;  %v576_v45 = vpop.f32.mrb[13].mxu1 }
 0x1f1   :  { %v577_v48 = vadd.f32 %v2155_v4, %v576_v45  ;;  %v1649_v49 = vpop.f32.mrb[14].mxu1  ;;  %1678 = vmatprep.mubr.msk.bf16.mxu0 %vm381_vm1, %v635_v42 }
 0x1f2   :  { %v588_v51 = vadd.f32 %v1649_v49, %v2155_v4  ;;  %v579_v53 = vpop.f32.mrb[15].mxu1  ;;  %1679 = vmatmul.mubr.msk.bf16.gmra.mrb[72].mxu0 %vm381_vm1, %v636_v39  ;;  %v621_v55 = vmax.f32 %v585_v44, 0.0 }
 0x1f3   :  { %v580_v54 = vadd.f32 %v2155_v4, %v579_v53  ;;  %v619_v57 = vmax.f32 %v577_v48, 0.0 }
 0x1f4   :  { %v622_v56 = vmax.f32 %v588_v51, 0.0 }
 0x1f5   :  { %v620_v58 = vmax.f32 %v580_v54, 0.0 }
 0x1f6   :  { %v638_v59 = vpack.c.bf16 %v622_v56, %v621_v55 }
 0x1f7   :  { %v637_v60 = vpack.c.bf16 %v620_v58, %v619_v57 }
 0x1f9   :  { %1682 = vmatprep.mubr.msk.bf16.mxu0 %vm381_vm1, %v637_v60 }
 0x1fa   :  { %1683 = vmatmul.mubr.msk.bf16.gmra.mrb[76].mxu0 %vm381_vm1, %v638_v59 }
 0x295   :  { %v1656_v62 = vpop.f32.mrb[48].mxu0 }
 0x296   :  { %v753_v63 = vadd.f32 %v1656_v62, %v2210_v61  ;;  %v744_v0 = vpop.f32.mrb[49].mxu0 }
 0x297   :  { %v745_v4 = vadd.f32 %v2210_v61, %v744_v0  ;;  %v1657_v1 = vpop.f32.mrb[50].mxu0 }
 0x298   :  { %v756_v2 = vadd.f32 %v1657_v1, %v2210_v61  ;;  %v747_v3 = vpop.f32.mrb[51].mxu0  ;;  %v873_v6 = vmax.f32 %v753_v63, 0.0 }
 0x299   :  { %v748_v5 = vadd.f32 %v2210_v61, %v747_v3  ;;  %v871_v10 = vmax.f32 %v745_v4, 0.0 }
 0x29a   :  { %v874_v7 = vmax.f32 %v756_v2, 0.0 }
 0x29b   :  { %v872_v11 = vmax.f32 %v748_v5, 0.0 }
 0x29c   :  { %v904_v52 = vpack.c.bf16 %v874_v7, %v873_v6 }
 0x29d   :  { %v903_v12 = vpack.c.bf16 %v872_v11, %v871_v10  ;;  %v1660_v8 = vpop.f32.mrb[52].mxu0 }
 0x29e   :  { %v769_v9 = vadd.f32 %v1660_v8, %v2210_v61  ;;  %v760_v14 = vpop.f32.mrb[53].mxu0 }
 0x29f   :  { %v761_v15 = vadd.f32 %v2210_v61, %v760_v14  ;;  %v1661_v22 = vpop.f32.mrb[54].mxu0  ;;  %1724 = vmatprep.mubr.msk.bf16.mxu1 %vm381_vm1, %v903_v12 }
 0x2a0   :  { %v772_v23 = vadd.f32 %v1661_v22, %v2210_v61  ;;  %v763_v28 = vpop.f32.mrb[55].mxu0  ;;  %1725 = vmatmul.mubr.msk.bf16.vlgmr.msra.gmra.mrb[16].mxu1 %vm381_vm1, %v904_v52  ;;  %v877_v34 = vmax.f32 %v769_v9, 0.0 }
 0x2a1   :  { %v764_v29 = vadd.f32 %v2210_v61, %v763_v28  ;;  %v875_v40 = vmax.f32 %v761_v15, 0.0 }
 0x2a2   :  { %v878_v35 = vmax.f32 %v772_v23, 0.0 }
 0x2a3   :  { %v876_v41 = vmax.f32 %v764_v29, 0.0 }
 0x2a4   :  { %v906_v46 = vpack.c.bf16 %v878_v35, %v877_v34 }
 0x2a5   :  { %v905_v47 = vpack.c.bf16 %v876_v41, %v875_v40  ;;  %v1664_v13 = vpop.f32.mrb[56].mxu0 }
 0x2a6   :  { %v785_v16 = vadd.f32 %v1664_v13, %v2210_v61  ;;  %v776_v17 = vpop.f32.mrb[57].mxu0 }
 0x2a7   :  { %v777_v50 = vadd.f32 %v2210_v61, %v776_v17  ;;  %v1665_v18 = vpop.f32.mrb[58].mxu0  ;;  %1728 = vmatprep.mubr.msk.bf16.mxu1 %vm381_vm1, %v905_v47 }
 0x2a8   :  { %v788_v19 = vadd.f32 %v1665_v18, %v2210_v61  ;;  %v779_v20 = vpop.f32.mrb[59].mxu0  ;;  %1729 = vmatmul.mubr.msk.bf16.gmra.mrb[20].mxu1 %vm381_vm1, %v906_v46  ;;  %v881_v24 = vmax.f32 %v785_v16, 0.0 }
 0x2a9   :  { %v780_v21 = vadd.f32 %v2210_v61, %v779_v20  ;;  %v879_v26 = vmax.f32 %v777_v50, 0.0 }
 0x2aa   :  { %v882_v25 = vmax.f32 %v788_v19, 0.0 }
 0x2ab   :  { %v880_v27 = vmax.f32 %v780_v21, 0.0 }
 0x2ac   :  { %v908_v30 = vpack.c.bf16 %v882_v25, %v881_v24 }
 0x2ad   :  { %v907_v31 = vpack.c.bf16 %v880_v27, %v879_v26  ;;  %v1668_v32 = vpop.f32.mrb[60].mxu0 }
 0x2ae   :  { %v801_v33 = vadd.f32 %v1668_v32, %v2210_v61  ;;  %v792_v36 = vpop.f32.mrb[61].mxu0 }
 0x2af   :  { %v793_v37 = vadd.f32 %v2210_v61, %v792_v36  ;;  %v1669_v38 = vpop.f32.mrb[62].mxu0  ;;  %1732 = vmatprep.mubr.msk.bf16.mxu1 %vm381_vm1, %v907_v31 }
 0x2b0   :  { %v804_v39 = vadd.f32 %v1669_v38, %v2210_v61  ;;  %v795_v42 = vpop.f32.mrb[63].mxu0  ;;  %1733 = vmatmul.mubr.msk.bf16.gmra.mrb[24].mxu1 %vm381_vm1, %v908_v30  ;;  %v885_v44 = vmax.f32 %v801_v33, 0.0 }
 0x2b1   :  { %v796_v43 = vadd.f32 %v2210_v61, %v795_v42  ;;  %v883_v48 = vmax.f32 %v793_v37, 0.0 }
 0x2b2   :  { %v886_v45 = vmax.f32 %v804_v39, 0.0 }
 0x2b3   :  { %v884_v49 = vmax.f32 %v796_v43, 0.0  ;;  %v2263_v43 = vld [vmem:[%s2318_s9] ss:$0 sm:$0xff]  ;;  %s1827_s9 = smov [#allocation2]  }
 0x2b4   :  { %v910_v51 = vpack.c.bf16 %v886_v45, %v885_v44  ;;  %s1389_s27 = sshll.u32 %s1827_s9, 4  ;;  %s1390_s27 = int_to_ptr.vmem [resolvable:$true] %s1389_s27 }
 0x2b5   :  { %v909_v53 = vpack.c.bf16 %v884_v49, %v883_v48  ;;  %v1672_v54 = vpop.f32.mrb[64].mxu0  ;;  %s1803_s28 = scalar_lea.vmem %s1390_s27, 4096  ;;  %p1808_p1 = scmp.lt.s32.totalorder %s1390_s27, %s1390_s27 }
 0x2b6   :  { %v817_v55 = vadd.f32 %v1672_v54, %v2210_v61  ;;  %v808_v56 = vpop.f32.mrb[65].mxu0  ;;  %p1804_p0 = scmp.ne.s32.totalorder %s1390_s27, %s1803_s28  ;;  %p1809_p2 = scmp.lt.s32.totalorder %s1803_s28, %s1803_s28 }
 0x2b7   :  { %v809_v57 = vadd.f32 %v2210_v61, %v808_v56  ;;  %v1673_v58 = vpop.f32.mrb[66].mxu0  ;;  %1736 = vmatprep.mubr.msk.bf16.mxu1 %vm381_vm1, %v909_v53 }
 0x2b8   :  { %v820_v59 = vadd.f32 %v1673_v58, %v2210_v61  ;;  %v811_v60 = vpop.f32.mrb[67].mxu0  ;;  %1737 = vmatmul.mubr.msk.bf16.gmra.mrb[28].mxu1 %vm381_vm1, %v910_v51  ;;  %v889_v63 = vmax.f32 %v817_v55, 0.0  ;;  %p1810_p3 = por %p1809_p2, %p1808_p1 }
 0x2b9   :  { %v812_v62 = vadd.f32 %v2210_v61, %v811_v60  ;;  %v887_v4 = vmax.f32 %v809_v57, 0.0 }
 0x2ba   :  { %v890_v0 = vmax.f32 %v820_v59, 0.0  ;;  %p1811_p4 = pnand %p1810_p3, %p1804_p0 }
 0x2bb   :  { %v888_v1 = vmax.f32 %v812_v62, 0.0 }
 0x2bc   :  { %v912_v2 = vpack.c.bf16 %v890_v0, %v889_v63 }
 0x2bd   :  { %v911_v3 = vpack.c.bf16 %v888_v1, %v887_v4  ;;  %v1676_v5 = vpop.f32.mrb[68].mxu0 }
 0x2be   :  { %v833_v6 = vadd.f32 %v1676_v5, %v2210_v61  ;;  %v824_v7 = vpop.f32.mrb[69].mxu0 }
 0x2bf   :  { %v825_v10 = vadd.f32 %v2210_v61, %v824_v7  ;;  %v1677_v11 = vpop.f32.mrb[70].mxu0  ;;  %1740 = vmatprep.mubr.msk.bf16.mxu1 %vm381_vm1, %v911_v3 }
 0x2c0   :  { %v836_v52 = vadd.f32 %v1677_v11, %v2210_v61  ;;  %v827_v12 = vpop.f32.mrb[71].mxu0  ;;  %1741 = vmatmul.mubr.msk.bf16.gmra.mrb[32].mxu1 %vm381_vm1, %v912_v2  ;;  %v893_v9 = vmax.f32 %v833_v6, 0.0 }
 0x2c1   :  { %v828_v8 = vadd.f32 %v2210_v61, %v827_v12  ;;  %v891_v15 = vmax.f32 %v825_v10, 0.0 }
 0x2c2   :  { %v894_v14 = vmax.f32 %v836_v52, 0.0 }
 0x2c3   :  { %v892_v22 = vmax.f32 %v828_v8, 0.0 }
 0x2c4   :  { %v914_v23 = vpack.c.bf16 %v894_v14, %v893_v9 }
 0x2c5   :  { %v913_v28 = vpack.c.bf16 %v892_v22, %v891_v15  ;;  %v1680_v29 = vpop.f32.mrb[72].mxu0 }
 0x2c6   :  { %v849_v34 = vadd.f32 %v1680_v29, %v2210_v61  ;;  %v840_v35 = vpop.f32.mrb[73].mxu0 }
 0x2c7   :  { %v841_v40 = vadd.f32 %v2210_v61, %v840_v35  ;;  %v1681_v41 = vpop.f32.mrb[74].mxu0  ;;  %1744 = vmatprep.mubr.msk.bf16.mxu1 %vm381_vm1, %v913_v28 }
 0x2c8   :  { %v852_v46 = vadd.f32 %v1681_v41, %v2210_v61  ;;  %v843_v47 = vpop.f32.mrb[75].mxu0  ;;  %1745 = vmatmul.mubr.msk.bf16.gmra.mrb[36].mxu1 %vm381_vm1, %v914_v23  ;;  %v897_v16 = vmax.f32 %v849_v34, 0.0 }
 0x2c9   :  { %v844_v13 = vadd.f32 %v2210_v61, %v843_v47  ;;  %v895_v50 = vmax.f32 %v841_v40, 0.0 }
 0x2ca   :  { %v898_v17 = vmax.f32 %v852_v46, 0.0 }
 0x2cb   :  { %v896_v18 = vmax.f32 %v844_v13, 0.0 }
 0x2cc   :  { %v916_v19 = vpack.c.bf16 %v898_v17, %v897_v16 }
 0x2cd   :  { %v915_v20 = vpack.c.bf16 %v896_v18, %v895_v50  ;;  %v1684_v21 = vpop.f32.mrb[76].mxu0 }
 0x2ce   :  { %v865_v24 = vadd.f32 %v1684_v21, %v2210_v61  ;;  %v856_v25 = vpop.f32.mrb[77].mxu0 }
 0x2cf   :  { %v857_v26 = vadd.f32 %v2210_v61, %v856_v25  ;;  %v1685_v27 = vpop.f32.mrb[78].mxu0  ;;  %1748 = vmatprep.mubr.msk.bf16.mxu1 %vm381_vm1, %v915_v20 }
 0x2d0   :  { %v868_v30 = vadd.f32 %v1685_v27, %v2210_v61  ;;  %v859_v31 = vpop.f32.mrb[79].mxu0  ;;  %1749 = vmatmul.mubr.msk.bf16.gmra.mrb[40].mxu1 %vm381_vm1, %v916_v19  ;;  %v901_v33 = vmax.f32 %v865_v24, 0.0 }
 0x2d1   :  { %v860_v32 = vadd.f32 %v2210_v61, %v859_v31  ;;  %v899_v37 = vmax.f32 %v857_v26, 0.0 }
 0x2d2   :  { %v902_v36 = vmax.f32 %v868_v30, 0.0 }
 0x2d3   :  { %v900_v38 = vmax.f32 %v860_v32, 0.0 }
 0x2d4   :  { %v918_v39 = vpack.c.bf16 %v902_v36, %v901_v33 }
 0x2d5   :  { %v917_v42 = vpack.c.bf16 %v900_v38, %v899_v37 }
 0x2d7   :  { %1752 = vmatprep.mubr.msk.bf16.mxu1 %vm381_vm1, %v917_v42 }
 0x2d8   :  { %1753 = vmatmul.mubr.msk.bf16.gmra.mrb[44].mxu1 %vm381_vm1, %v918_v39 }
 0x373   :  { %v1726_v44 = vpop.f32.mrb[16].mxu1 }
 0x374   :  { %v1322_v45 = vadd.f32 %v1726_v44, %v2263_v43  ;;  %v1186_v48 = vpop.f32.mrb[17].mxu1 }
 0x375   :  { %v1320_v61 = vadd.f32 %v2263_v43, %v1186_v48  ;;  %v1727_v49 = vpop.f32.mrb[18].mxu1 }
 0x376   :  { %1354 = vst [vmem:[#allocation2 + $0x10] sm:$0xff] %v1322_v45  ;;  %v1323_v51 = vadd.f32 %v1727_v49, %v2263_v43  ;;  %v1189_v53 = vpop.f32.mrb[19].mxu1 }
 0x377   :  { %1352 = vst [vmem:[#allocation2] sm:$0xff] %v1320_v61  ;;  %v1321_v54 = vadd.f32 %v2263_v43, %v1189_v53 }
 0x378   :  { %1355 = vst [vmem:[#allocation2 + $0x18] sm:$0xff] %v1323_v51 }
 0x379   :  { %1353 = vst [vmem:[#allocation2 + $0x8] sm:$0xff] %v1321_v54 }
 0x37b   :  { %v1730_v55 = vpop.f32.mrb[20].mxu1 }
 0x37c   :  { %v1326_v56 = vadd.f32 %v1730_v55, %v2263_v43  ;;  %v1202_v57 = vpop.f32.mrb[21].mxu1 }
 0x37d   :  { %v1324_v58 = vadd.f32 %v2263_v43, %v1202_v57  ;;  %v1731_v59 = vpop.f32.mrb[22].mxu1 }
 0x37e   :  { %1358 = vst [vmem:[#allocation2 + $0x30] sm:$0xff] %v1326_v56  ;;  %v1327_v60 = vadd.f32 %v1731_v59, %v2263_v43  ;;  %v1205_v62 = vpop.f32.mrb[23].mxu1 }
 0x37f   :  { %1356 = vst [vmem:[#allocation2 + $0x20] sm:$0xff] %v1324_v58  ;;  %v1325_v63 = vadd.f32 %v2263_v43, %v1205_v62 }
 0x380   :  { %1359 = vst [vmem:[#allocation2 + $0x38] sm:$0xff] %v1327_v60 }
 0x381   :  { %1357 = vst [vmem:[#allocation2 + $0x28] sm:$0xff] %v1325_v63 }
 0x383   :  { %v1734_v0 = vpop.f32.mrb[24].mxu1 }
 0x384   :  { %v1330_v4 = vadd.f32 %v1734_v0, %v2263_v43  ;;  %v1218_v1 = vpop.f32.mrb[25].mxu1 }
 0x385   :  { %v1328_v2 = vadd.f32 %v2263_v43, %v1218_v1  ;;  %v1735_v3 = vpop.f32.mrb[26].mxu1 }
 0x386   :  { %1362 = vst [vmem:[#allocation2 + $0x50] sm:$0xff] %v1330_v4  ;;  %v1331_v5 = vadd.f32 %v1735_v3, %v2263_v43  ;;  %v1221_v6 = vpop.f32.mrb[27].mxu1 }
 0x387   :  { %1360 = vst [vmem:[#allocation2 + $0x40] sm:$0xff] %v1328_v2  ;;  %v1329_v7 = vadd.f32 %v2263_v43, %v1221_v6 }
 0x388   :  { %1363 = vst [vmem:[#allocation2 + $0x58] sm:$0xff] %v1331_v5 }
 0x389   :  { %1361 = vst [vmem:[#allocation2 + $0x48] sm:$0xff] %v1329_v7 }
 0x38b   :  { %v1738_v10 = vpop.f32.mrb[28].mxu1 }
 0x38c   :  { %v1334_v11 = vadd.f32 %v1738_v10, %v2263_v43  ;;  %v1234_v52 = vpop.f32.mrb[29].mxu1 }
 0x38d   :  { %v1332_v12 = vadd.f32 %v2263_v43, %v1234_v52  ;;  %v1739_v8 = vpop.f32.mrb[30].mxu1 }
 0x38e   :  { %1366 = vst [vmem:[#allocation2 + $0x70] sm:$0xff] %v1334_v11  ;;  %v1335_v9 = vadd.f32 %v1739_v8, %v2263_v43  ;;  %v1237_v14 = vpop.f32.mrb[31].mxu1 }
 0x38f   :  { %1364 = vst [vmem:[#allocation2 + $0x60] sm:$0xff] %v1332_v12  ;;  %v1333_v15 = vadd.f32 %v2263_v43, %v1237_v14 }
 0x390   :  { %1367 = vst [vmem:[#allocation2 + $0x78] sm:$0xff] %v1335_v9 }
 0x391   :  { %1365 = vst [vmem:[#allocation2 + $0x68] sm:$0xff] %v1333_v15 }
 0x393   :  { %v1742_v22 = vpop.f32.mrb[32].mxu1 }
 0x394   :  { %v1338_v23 = vadd.f32 %v1742_v22, %v2263_v43  ;;  %v1250_v28 = vpop.f32.mrb[33].mxu1 }
 0x395   :  { %v1336_v29 = vadd.f32 %v2263_v43, %v1250_v28  ;;  %v1743_v34 = vpop.f32.mrb[34].mxu1 }
 0x396   :  { %1370 = vst [vmem:[#allocation2 + $0x90] sm:$0xff] %v1338_v23  ;;  %v1339_v35 = vadd.f32 %v1743_v34, %v2263_v43  ;;  %v1253_v40 = vpop.f32.mrb[35].mxu1 }
 0x397   :  { %1368 = vst [vmem:[#allocation2 + $0x80] sm:$0xff] %v1336_v29  ;;  %v1337_v41 = vadd.f32 %v2263_v43, %v1253_v40 }
 0x398   :  { %1371 = vst [vmem:[#allocation2 + $0x98] sm:$0xff] %v1339_v35 }
 0x399   :  { %1369 = vst [vmem:[#allocation2 + $0x88] sm:$0xff] %v1337_v41 }
 0x39b   :  { %v1746_v46 = vpop.f32.mrb[36].mxu1 }
 0x39c   :  { %v1342_v47 = vadd.f32 %v1746_v46, %v2263_v43  ;;  %v1266_v13 = vpop.f32.mrb[37].mxu1 }
 0x39d   :  { %v1340_v16 = vadd.f32 %v2263_v43, %v1266_v13  ;;  %v1747_v17 = vpop.f32.mrb[38].mxu1 }
 0x39e   :  { %1374 = vst [vmem:[#allocation2 + $0xb0] sm:$0xff] %v1342_v47  ;;  %v1343_v50 = vadd.f32 %v1747_v17, %v2263_v43  ;;  %v1269_v18 = vpop.f32.mrb[39].mxu1 }
 0x39f   :  { %1372 = vst [vmem:[#allocation2 + $0xa0] sm:$0xff] %v1340_v16  ;;  %v1341_v19 = vadd.f32 %v2263_v43, %v1269_v18 }
 0x3a0   :  { %1375 = vst [vmem:[#allocation2 + $0xb8] sm:$0xff] %v1343_v50 }
 0x3a1   :  { %1373 = vst [vmem:[#allocation2 + $0xa8] sm:$0xff] %v1341_v19 }
 0x3a3   :  { %v1750_v20 = vpop.f32.mrb[40].mxu1 }
 0x3a4   :  { %v1346_v21 = vadd.f32 %v1750_v20, %v2263_v43  ;;  %v1282_v24 = vpop.f32.mrb[41].mxu1 }
 0x3a5   :  { %v1344_v25 = vadd.f32 %v2263_v43, %v1282_v24  ;;  %v1751_v26 = vpop.f32.mrb[42].mxu1 }
 0x3a6   :  { %1378 = vst [vmem:[#allocation2 + $0xd0] sm:$0xff] %v1346_v21  ;;  %v1347_v27 = vadd.f32 %v1751_v26, %v2263_v43  ;;  %v1285_v30 = vpop.f32.mrb[43].mxu1 }
 0x3a7   :  { %1376 = vst [vmem:[#allocation2 + $0xc0] sm:$0xff] %v1344_v25  ;;  %v1345_v31 = vadd.f32 %v2263_v43, %v1285_v30 }
 0x3a8   :  { %1379 = vst [vmem:[#allocation2 + $0xd8] sm:$0xff] %v1347_v27 }
 0x3a9   :  { %1377 = vst [vmem:[#allocation2 + $0xc8] sm:$0xff] %v1345_v31 }
 0x3ab   :  { %v1754_v32 = vpop.f32.mrb[44].mxu1 }
 0x3ac   :  { %v1350_v33 = vadd.f32 %v1754_v32, %v2263_v43  ;;  %v1298_v36 = vpop.f32.mrb[45].mxu1 }
 0x3ad   :  { %v1348_v37 = vadd.f32 %v2263_v43, %v1298_v36  ;;  %v1755_v38 = vpop.f32.mrb[46].mxu1 }
 0x3ae   :  { %1382 = vst [vmem:[#allocation2 + $0xf0] sm:$0xff] %v1350_v33  ;;  %v1351_v39 = vadd.f32 %v1755_v38, %v2263_v43  ;;  %v1301_v42 = vpop.f32.mrb[47].mxu1 }
 0x3af   :  { %1380 = vst [vmem:[#allocation2 + $0xe0] sm:$0xff] %v1348_v37  ;;  %v1349_v44 = vadd.f32 %v2263_v43, %v1301_v42 }
 0x3b0   :  { %1383 = vst [vmem:[#allocation2 + $0xf8] sm:$0xff] %v1351_v39 }
 0x3b1   :  { %1381 = vst [vmem:[#allocation2 + $0xe8] sm:$0xff] %v1349_v44 }
 0x3b2   :  { %1814 = shalt.err (!%p1811_p4)
}
 0x3b3   :  { %s1815_s11 = scalar_lea.hbm %s2319_s10, 4096 }
 0x3b4   :  { %p1816_p5 = scmp.ne.s32.totalorder %s2319_s10, %s1815_s11  ;;  %p1819_p6 = scmp.lt.u32.totalorder %s1815_s11, %s2319_s10 }
 0x3b6   :  { %p1821_p7 = pnand %p1819_p6, %p1816_p5 }
 0x3b8   :  { %1824 = shalt.err (!%p1821_p7)
}
 0x3b9   :  { %s1828_s16 = smov 128   ;;  %s1829_s17 = smov 8  }
 0x3ba   :  { %1395 = dma.vmem_to_hbm [thread:$0]  %s1390_s27, 4096, %s2319_s10, [#allocation3], %s1828_s16, %s1828_s16, %s1829_s17  }
 0x3bb   :  { %1825 = dma.done.wait [#allocation3], 4096  }
 0x3bc   :  { %1826 = vsyncadd [#allocation3], 4294963200 }
 0x3bd   :  { %1399 = vsyncpa [#allocation3], 1 }

// kernel: tpu_custom_call.1
= control target key start
LH: loop header
LB: loop body
LE: loop exit
PB: predicated region body
PF: predicated region fallthrough
CT: control target
= control target key end

     0   :  { %vm100_vm0 = vcmask 130048   ;;  %s2309_s0 = inlined_call_operand.vmem [shape: f32[256,16], index: 0, kind: input, shape index: {}]   ;;  %s2310_s1 = inlined_call_operand.vmem [shape: bf16[16,32], index: 1, kind: input, shape index: {}]   ;;  %s2311_s2 = inlined_call_operand.vmem [shape: f32[1,32], index: 2, kind: input, shape index: {}]   ;;  %s2312_s3 = inlined_call_operand.vmem [shape: bf16[32,32], index: 3, kind: input, shape index: {}]   ;;  %s2313_s4 = inlined_call_operand.vmem [shape: f32[1,32], index: 4, kind: input, shape index: {}]   ;;  %s2314_s5 = inlined_call_operand.vmem [shape: bf16[32,32], index: 5, kind: input, shape index: {}]   ;;  %s2315_s6 = inlined_call_operand.vmem [shape: f32[1,32], index: 6, kind: input, shape index: {}]   ;;  %s2316_s7 = inlined_call_operand.vmem [shape: bf16[32,128], index: 7, kind: input, shape index: {}]   ;;  %s2317_s8 = inlined_call_operand.vmem [shape: bf16[16,128], index: 8, kind: input, shape index: {}]   ;;  %s2318_s9 = inlined_call_operand.vmem [shape: f32[1,128], index: 9, kind: input, shape index: {}]   ;;  %s2319_s10 = inlined_call_operand.hbm [shape: f32[256,128], index: 10, kind: output, shape index: {}]  }
   0x1   :  { %v1795_v0 = vld [vmem:[%s2310_s1] sm:$0xff]   ;;  %v38_v2 = vld [vmem:[%s2309_s0 + $0x8] sm:$0xff]  ;;  %v39_v3 = vld [vmem:[%s2309_s0 + $0x10] sm:$0xff] }
   0x2   :  { %v37_v1 = vld [vmem:[%s2309_s0] sm:$0xff]  ;;  %1580 = vmatprep.subr.bf16.mxu0 %v1795_v0  ;;  %v40_v5 = vld [vmem:[%s2309_s0 + $0x18] sm:$0xff]  ;;  %v42_v7 = vld [vmem:[%s2309_s0 + $0x28] sm:$0xff] }
   0x3   :  { %v1897_v4 = vpack.c.bf16 %v38_v2, %v37_v1  ;;  %v41_v6 = vld [vmem:[%s2309_s0 + $0x20] sm:$0xff]  ;;  %1581 = vmatpush3.bf16.msra.mxu0 %v1795_v0  ;;  %v1908_v8 = vpack.c.bf16 %v40_v5, %v39_v3  ;;  %v43_v10 = vld [vmem:[%s2309_s0 + $0x30] sm:$0xff]  ;;  %v44_v11 = vld [vmem:[%s2309_s0 + $0x38] sm:$0xff] }
   0x4   :  { %v1910_v9 = vpack.c.bf16 %v42_v7, %v41_v6  ;;  %v45_v12 = vld [vmem:[%s2309_s0 + $0x40] sm:$0xff]  ;;  %v46_v13 = vld [vmem:[%s2309_s0 + $0x48] sm:$0xff]  ;;  %v1930_v14 = vpack.c.bf16 %v44_v11, %v43_v10  ;;  %v47_v17 = vld [vmem:[%s2309_s0 + $0x50] sm:$0xff] }
   0x5   :  { %1582 = vmatprep.mubr.msk.bf16.mxu0 %vm100_vm0, %v1897_v4  ;;  %v1932_v15 = vpack.c.bf16 %v46_v13, %v45_v12  ;;  %v1796_v16 = vld [vmem:[%s2312_s3] sm:$0xff]   ;;  %v48_v18 = vld [vmem:[%s2309_s0 + $0x58] sm:$0xff]  ;;  %v1797_v19 = vld [vmem:[%s2312_s3 + $0x8] sm:$0xff]  }
   0x6   :  { %1583 = vmatmul.mubr.msk.bf16.vlgmr.msra.gmra.mrb[0].mxu0 %vm100_vm0, %v1908_v8  ;;  %v49_v20 = vld [vmem:[%s2309_s0 + $0x60] sm:$0xff]  ;;  %v50_v21 = vld [vmem:[%s2309_s0 + $0x68] sm:$0xff]  ;;  %1614 = vmatprep.subr.bf16.mxu0 %v1796_v16 }
   0x7   :  { %1586 = vmatprep.mubr.msk.bf16.mxu0 %vm100_vm0, %v1910_v9  ;;  %1615 = vmatpush3.bf16.msra.mxu0 %v1796_v16 }
   0x8   :  { %1616 = vmatprep.subr.bf16.mxu0 %v1797_v19  ;;  %1756 = vmatprep.subr.bf16.mxu1 %v1796_v16 }
   0x9   :  { %1758 = vmatpush3.bf16.msra.mxu1 %v1796_v16 }
   0xe   :  { %1587 = vmatmul.mubr.msk.bf16.gmra.mrb[4].mxu0 %vm100_vm0, %v1930_v14 }
   0xf   :  { %1590 = vmatprep.mubr.msk.bf16.mxu0 %vm100_vm0, %v1932_v15 }
  0x10   :  { %15 = vsyncpa [#allocation3], 0  ;;  %v1956_v22 = vpack.c.bf16 %v48_v18, %v47_v17  ;;  %1757 = vmatprep.subr.bf16.mxu1 %v1797_v19  ;;  %v1958_v23 = vpack.c.bf16 %v50_v21, %v49_v20  ;;  %1617 = vmatpush3.bf16.msra.mxu0 %v1797_v19  ;;  %v51_v24 = vld [vmem:[%s2309_s0 + $0x70] sm:$0xff]  ;;  %v52_v25 = vld [vmem:[%s2309_s0 + $0x78] sm:$0xff]  ;;  %vm381_vm1 = vcmask 261120  }
  0x11   :  { %1759 = vmatpush3.bf16.msra.mxu1 %v1797_v19  ;;  %v53_v26 = vld [vmem:[%s2309_s0 + $0x80] sm:$0xff]  ;;  %v54_v27 = vld [vmem:[%s2309_s0 + $0x88] sm:$0xff]  ;;  %v1976_v28 = vpack.c.bf16 %v52_v25, %v51_v24  ;;  %v55_v30 = vld [vmem:[%s2309_s0 + $0x90] sm:$0xff] }
  0x12   :  { %v1978_v29 = vpack.c.bf16 %v54_v27, %v53_v26  ;;  %v56_v31 = vld [vmem:[%s2309_s0 + $0x98] sm:$0xff]  ;;  %v57_v32 = vld [vmem:[%s2309_s0 + $0xa0] sm:$0xff]  ;;  %v58_v33 = vld [vmem:[%s2309_s0 + $0xa8] sm:$0xff] }
  0x13   :  { %v1996_v34 = vpack.c.bf16 %v56_v31, %v55_v30  ;;  %v1998_v35 = vpack.c.bf16 %v58_v33, %v57_v32  ;;  %v59_v36 = vld [vmem:[%s2309_s0 + $0xb0] sm:$0xff]  ;;  %v60_v37 = vld [vmem:[%s2309_s0 + $0xb8] sm:$0xff]  ;;  %v61_v38 = vld [vmem:[%s2309_s0 + $0xc0] sm:$0xff] }
  0x14   :  { %v62_v39 = vld [vmem:[%s2309_s0 + $0xc8] sm:$0xff]  ;;  %v2016_v40 = vpack.c.bf16 %v60_v37, %v59_v36  ;;  %v63_v42 = vld [vmem:[%s2309_s0 + $0xd0] sm:$0xff]  ;;  %v64_v43 = vld [vmem:[%s2309_s0 + $0xd8] sm:$0xff] }
  0x15   :  { %v2018_v41 = vpack.c.bf16 %v62_v39, %v61_v38  ;;  %v65_v44 = vld [vmem:[%s2309_s0 + $0xe0] sm:$0xff]  ;;  %v66_v45 = vld [vmem:[%s2309_s0 + $0xe8] sm:$0xff]  ;;  %v2036_v46 = vpack.c.bf16 %v64_v43, %v63_v42  ;;  %v67_v48 = vld [vmem:[%s2309_s0 + $0xf0] sm:$0xff] }
  0x16   :  { %1591 = vmatmul.mubr.msk.bf16.gmra.mrb[8].mxu0 %vm100_vm0, %v1956_v22  ;;  %v2038_v47 = vpack.c.bf16 %v66_v45, %v65_v44  ;;  %v68_v49 = vld [vmem:[%s2309_s0 + $0xf8] sm:$0xff]  ;;  %v1798_v51 = vld [vmem:[%s2314_s5] sm:$0xff]   ;;  %v1799_v7 = vld [vmem:[%s2314_s5 + $0x8] sm:$0xff]  }
  0x17   :  { %1594 = vmatprep.mubr.msk.bf16.mxu0 %vm100_vm0, %v1958_v23  ;;  %v2050_v50 = vpack.c.bf16 %v68_v49, %v67_v48  ;;  %1650 = vmatprep.subr.bf16.mxu0 %v1798_v51  ;;  %v2060_v52 = vld [vmem:[%s2311_s2] ss:$0 sm:$0xff] }
  0x1e   :  { %1595 = vmatmul.mubr.msk.bf16.gmra.mrb[12].mxu0 %vm100_vm0, %v1976_v28 }
  0x1f   :  { %1598 = vmatprep.mubr.msk.bf16.mxu0 %vm100_vm0, %v1978_v29 }
  0x26   :  { %1599 = vmatmul.mubr.msk.bf16.gmra.mrb[16].mxu0 %vm100_vm0, %v1996_v34 }
  0x27   :  { %1602 = vmatprep.mubr.msk.bf16.mxu0 %vm100_vm0, %v1998_v35 }
  0x2e   :  { %1603 = vmatmul.mubr.msk.bf16.gmra.mrb[20].mxu0 %vm100_vm0, %v2016_v40 }
  0x2f   :  { %1606 = vmatprep.mubr.msk.bf16.mxu0 %vm100_vm0, %v2018_v41 }
  0x36   :  { %1607 = vmatmul.mubr.msk.bf16.gmra.mrb[24].mxu0 %vm100_vm0, %v2036_v46 }
  0x37   :  { %1610 = vmatprep.mubr.msk.bf16.mxu0 %vm100_vm0, %v2038_v47 }
  0x3e   :  { %1611 = vmatmul.mubr.msk.bf16.gmra.mrb[28].mxu0 %vm100_vm0, %v2050_v50 }
  0xd9   :  { %v1584_v53 = vpop.f32.mrb[0].mxu0 }
  0xda   :  { %v192_v54 = vadd.f32 %v1584_v53, %v2060_v52  ;;  %v183_v55 = vpop.f32.mrb[1].mxu0 }
  0xdb   :  { %v184_v56 = vadd.f32 %v2060_v52, %v183_v55  ;;  %v1585_v57 = vpop.f32.mrb[2].mxu0 }
  0xdc   :  { %v195_v58 = vadd.f32 %v1585_v57, %v2060_v52  ;;  %v186_v59 = vpop.f32.mrb[3].mxu0  ;;  %v312_v61 = vmax.f32 %v192_v54, 0.0 }
  0xdd   :  { %v187_v60 = vadd.f32 %v2060_v52, %v186_v59  ;;  %v310_v63 = vmax.f32 %v184_v56, 0.0 }
  0xde   :  { %v313_v62 = vmax.f32 %v195_v58, 0.0 }
  0xdf   :  { %v311_v0 = vmax.f32 %v187_v60, 0.0 }
  0xe0   :  { %v343_v1 = vpack.c.bf16 %v313_v62, %v312_v61 }
  0xe1   :  { %v342_v2 = vpack.c.bf16 %v311_v0, %v310_v63  ;;  %v1588_v3 = vpop.f32.mrb[4].mxu0 }
  0xe2   :  { %v208_v5 = vadd.f32 %v1588_v3, %v2060_v52  ;;  %v199_v6 = vpop.f32.mrb[5].mxu0 }
  0xe3   :  { %v200_v10 = vadd.f32 %v2060_v52, %v199_v6  ;;  %v1589_v11 = vpop.f32.mrb[6].mxu0  ;;  %1618 = vmatprep.mubr.msk.bf16.mxu0 %vm381_vm1, %v342_v2 }
  0xe4   :  { %v211_v12 = vadd.f32 %v1589_v11, %v2060_v52  ;;  %v202_v13 = vpop.f32.mrb[7].mxu0  ;;  %1619 = vmatmul.mubr.msk.bf16.vlgmr.msra.gmra.mrb[32].mxu0 %vm381_vm1, %v343_v1  ;;  %v316_v17 = vmax.f32 %v208_v5, 0.0 }
  0xe5   :  { %v203_v16 = vadd.f32 %v2060_v52, %v202_v13  ;;  %1651 = vmatpush3.bf16.msra.mxu0 %v1798_v51  ;;  %v314_v19 = vmax.f32 %v200_v10, 0.0 }
  0xe6   :  { %v317_v18 = vmax.f32 %v211_v12, 0.0  ;;  %1652 = vmatprep.subr.bf16.mxu0 %v1799_v7 }
  0xe7   :  { %v315_v20 = vmax.f32 %v203_v16, 0.0 }
  0xe8   :  { %v345_v21 = vpack.c.bf16 %v317_v18, %v316_v17 }
  0xe9   :  { %v344_v24 = vpack.c.bf16 %v315_v20, %v314_v19  ;;  %v1592_v25 = vpop.f32.mrb[8].mxu0  ;;  %1653 = vmatpush3.bf16.msra.mxu0 %v1799_v7 }
  0xea   :  { %v224_v26 = vadd.f32 %v1592_v25, %v2060_v52  ;;  %v215_v27 = vpop.f32.mrb[9].mxu0 }
  0xeb   :  { %v216_v30 = vadd.f32 %v2060_v52, %v215_v27  ;;  %v1593_v31 = vpop.f32.mrb[10].mxu0  ;;  %1622 = vmatprep.mubr.msk.bf16.mxu0 %vm381_vm1, %v344_v24 }
  0xec   :  { %v227_v32 = vadd.f32 %v1593_v31, %v2060_v52  ;;  %v218_v33 = vpop.f32.mrb[11].mxu0  ;;  %1623 = vmatmul.mubr.msk.bf16.gmra.mrb[36].mxu0 %vm381_vm1, %v345_v21  ;;  %v320_v37 = vmax.f32 %v224_v26, 0.0 }
  0xed   :  { %v219_v36 = vadd.f32 %v2060_v52, %v218_v33  ;;  %v318_v39 = vmax.f32 %v216_v30, 0.0 }
  0xee   :  { %v321_v38 = vmax.f32 %v227_v32, 0.0 }
  0xef   :  { %v319_v42 = vmax.f32 %v219_v36, 0.0 }
  0xf0   :  { %v347_v43 = vpack.c.bf16 %v321_v38, %v320_v37 }
  0xf1   :  { %v346_v44 = vpack.c.bf16 %v319_v42, %v318_v39  ;;  %v1596_v45 = vpop.f32.mrb[12].mxu0 }
  0xf2   :  { %v240_v48 = vadd.f32 %v1596_v45, %v2060_v52  ;;  %v231_v49 = vpop.f32.mrb[13].mxu0 }
  0xf3   :  { %v232_v51 = vadd.f32 %v2060_v52, %v231_v49  ;;  %v1597_v53 = vpop.f32.mrb[14].mxu0  ;;  %1626 = vmatprep.mubr.msk.bf16.mxu0 %vm381_vm1, %v346_v44 }
  0xf4   :  { %v243_v54 = vadd.f32 %v1597_v53, %v2060_v52  ;;  %v234_v55 = vpop.f32.mrb[15].mxu0  ;;  %1627 = vmatmul.mubr.msk.bf16.gmra.mrb[40].mxu0 %vm381_vm1, %v347_v43  ;;  %v324_v57 = vmax.f32 %v240_v48, 0.0 }
  0xf5   :  { %v235_v56 = vadd.f32 %v2060_v52, %v234_v55  ;;  %v322_v59 = vmax.f32 %v232_v51, 0.0 }
  0xf6   :  { %v325_v58 = vmax.f32 %v243_v54, 0.0 }
  0xf7   :  { %v323_v60 = vmax.f32 %v235_v56, 0.0 }
  0xf8   :  { %v349_v61 = vpack.c.bf16 %v325_v58, %v324_v57 }
  0xf9   :  { %v348_v62 = vpack.c.bf16 %v323_v60, %v322_v59  ;;  %v1600_v63 = vpop.f32.mrb[16].mxu0 }
  0xfa   :  { %v256_v0 = vadd.f32 %v1600_v63, %v2060_v52  ;;  %v247_v1 = vpop.f32.mrb[17].mxu0 }
  0xfb   :  { %v248_v2 = vadd.f32 %v2060_v52, %v247_v1  ;;  %v1601_v3 = vpop.f32.mrb[18].mxu0  ;;  %1630 = vmatprep.mubr.msk.bf16.mxu0 %vm381_vm1, %v348_v62 }
  0xfc   :  { %v259_v5 = vadd.f32 %v1601_v3, %v2060_v52  ;;  %v250_v6 = vpop.f32.mrb[19].mxu0  ;;  %1631 = vmatmul.mubr.msk.bf16.gmra.mrb[44].mxu0 %vm381_vm1, %v349_v61  ;;  %v328_v10 = vmax.f32 %v256_v0, 0.0 }
  0xfd   :  { %v251_v7 = vadd.f32 %v2060_v52, %v250_v6  ;;  %v326_v12 = vmax.f32 %v248_v2, 0.0 }
  0xfe   :  { %v329_v11 = vmax.f32 %v259_v5, 0.0 }
  0xff   :  { %v327_v13 = vmax.f32 %v251_v7, 0.0 }
 0x100   :  { %v351_v16 = vpack.c.bf16 %v329_v11, %v328_v10  ;;  %v1800_v11 = vld [vmem:[%s2317_s8] sm:$0xff]  }
 0x101   :  { %v1604_v17 = vpop.f32.mrb[20].mxu0  ;;  %v350_v18 = vpack.c.bf16 %v327_v13, %v326_v12  ;;  %1686 = vmatprep.subr.bf16.mxu1 %v1800_v11  ;;  %v1802_v12 = vld [vmem:[%s2316_s7 + $0x8] sm:$0xff]  }
 0x102   :  { %v272_v19 = vadd.f32 %v1604_v17, %v2060_v52  ;;  %v263_v20 = vpop.f32.mrb[21].mxu0 }
 0x103   :  { %v264_v21 = vadd.f32 %v2060_v52, %v263_v20  ;;  %v1605_v24 = vpop.f32.mrb[22].mxu0  ;;  %1634 = vmatprep.mubr.msk.bf16.mxu1 %vm381_vm1, %v350_v18 }
 0x104   :  { %v275_v25 = vadd.f32 %v1605_v24, %v2060_v52  ;;  %v266_v26 = vpop.f32.mrb[23].mxu0  ;;  %1635 = vmatmul.mubr.msk.bf16.vlgmr.msra.gmra.mrb[0].mxu1 %vm381_vm1, %v351_v16  ;;  %v332_v30 = vmax.f32 %v272_v19, 0.0 }
 0x105   :  { %v267_v27 = vadd.f32 %v2060_v52, %v266_v26  ;;  %v330_v32 = vmax.f32 %v264_v21, 0.0  ;;  %1687 = vmatpush3.bf16.msra.mxu1 %v1800_v11 }
 0x106   :  { %v333_v31 = vmax.f32 %v275_v25, 0.0 }
 0x107   :  { %v331_v33 = vmax.f32 %v267_v27, 0.0 }
 0x108   :  { %v353_v36 = vpack.c.bf16 %v333_v31, %v332_v30 }
 0x109   :  { %v352_v37 = vpack.c.bf16 %v331_v33, %v330_v32  ;;  %v1608_v38 = vpop.f32.mrb[24].mxu0 }
 0x10a   :  { %v288_v39 = vadd.f32 %v1608_v38, %v2060_v52  ;;  %v279_v42 = vpop.f32.mrb[25].mxu0 }
 0x10b   :  { %v280_v43 = vadd.f32 %v2060_v52, %v279_v42  ;;  %v1609_v44 = vpop.f32.mrb[26].mxu0  ;;  %1638 = vmatprep.mubr.msk.bf16.mxu1 %vm381_vm1, %v352_v37 }
 0x10c   :  { %v291_v45 = vadd.f32 %v1609_v44, %v2060_v52  ;;  %v282_v48 = vpop.f32.mrb[27].mxu0  ;;  %1639 = vmatmul.mubr.msk.bf16.gmra.mrb[4].mxu1 %vm381_vm1, %v353_v36  ;;  %v336_v51 = vmax.f32 %v288_v39, 0.0 }
 0x10d   :  { %v283_v49 = vadd.f32 %v2060_v52, %v282_v48  ;;  %v334_v54 = vmax.f32 %v280_v43, 0.0 }
 0x10e   :  { %v337_v53 = vmax.f32 %v291_v45, 0.0 }
 0x10f   :  { %v335_v55 = vmax.f32 %v283_v49, 0.0 }
 0x110   :  { %v355_v56 = vpack.c.bf16 %v337_v53, %v336_v51 }
 0x111   :  { %v354_v57 = vpack.c.bf16 %v335_v55, %v334_v54  ;;  %v1612_v58 = vpop.f32.mrb[28].mxu0 }
 0x112   :  { %v304_v59 = vadd.f32 %v1612_v58, %v2060_v52  ;;  %v295_v60 = vpop.f32.mrb[29].mxu0 }
 0x113   :  { %v296_v61 = vadd.f32 %v2060_v52, %v295_v60  ;;  %v1613_v62 = vpop.f32.mrb[30].mxu0  ;;  %1642 = vmatprep.mubr.msk.bf16.mxu1 %vm381_vm1, %v354_v57 }
 0x114   :  { %v307_v63 = vadd.f32 %v1613_v62, %v2060_v52  ;;  %v298_v0 = vpop.f32.mrb[31].mxu0  ;;  %1643 = vmatmul.mubr.msk.bf16.gmra.mrb[8].mxu1 %vm381_vm1, %v355_v56  ;;  %v340_v2 = vmax.f32 %v304_v59, 0.0 }
 0x115   :  { %v299_v1 = vadd.f32 %v2060_v52, %v298_v0  ;;  %v338_v5 = vmax.f32 %v296_v61, 0.0  ;;  %v1801_v52 = vld [vmem:[%s2316_s7] sm:$0xff]  }
 0x116   :  { %v341_v3 = vmax.f32 %v307_v63, 0.0  ;;  %1720 = vmatprep.subr.bf16.mxu1 %v1801_v52 }
 0x117   :  { %v339_v6 = vmax.f32 %v299_v1, 0.0 }
 0x118   :  { %v357_v7 = vpack.c.bf16 %v341_v3, %v340_v2 }
 0x119   :  { %v356_v10 = vpack.c.bf16 %v339_v6, %v338_v5 }
 0x11b   :  { %1646 = vmatprep.mubr.msk.bf16.mxu1 %vm381_vm1, %v356_v10 }
 0x11c   :  { %1647 = vmatmul.mubr.msk.bf16.gmra.mrb[12].mxu1 %vm381_vm1, %v357_v7 }
 0x11d   :  { %1688 = vmatprep.mubr.msk.bf16.mxu1 %vm100_vm0, %v1897_v4  ;;  %v2155_v4 = vld [vmem:[%s2313_s4] ss:$0 sm:$0xff] }
 0x124   :  { %1689 = vmatmul.mubr.msk.bf16.vlgmr.msra.gmra.mrb[16].mxu1 %vm100_vm0, %v1908_v8 }
 0x125   :  { %1721 = vmatpush3.bf16.msra.mxu1 %v1801_v52  ;;  %1692 = vmatprep.mubr.msk.bf16.mxu1 %vm100_vm0, %v1910_v9 }
 0x126   :  { %1722 = vmatprep.subr.bf16.mxu1 %v1802_v12 }
 0x129   :  { %1723 = vmatpush3.bf16.msra.mxu1 %v1802_v12 }
 0x12c   :  { %1693 = vmatmul.mubr.msk.bf16.gmra.mrb[20].mxu1 %vm100_vm0, %v1930_v14 }
 0x12d   :  { %1696 = vmatprep.mubr.msk.bf16.mxu1 %vm100_vm0, %v1932_v15 }
 0x134   :  { %1697 = vmatmul.mubr.msk.bf16.gmra.mrb[24].mxu1 %vm100_vm0, %v1956_v22 }
 0x135   :  { %1700 = vmatprep.mubr.msk.bf16.mxu1 %vm100_vm0, %v1958_v23 }
 0x13c   :  { %1701 = vmatmul.mubr.msk.bf16.gmra.mrb[28].mxu1 %vm100_vm0, %v1976_v28 }
 0x13d   :  { %1704 = vmatprep.mubr.msk.bf16.mxu1 %vm100_vm0, %v1978_v29 }
 0x144   :  { %1705 = vmatmul.mubr.msk.bf16.gmra.mrb[32].mxu1 %vm100_vm0, %v1996_v34 }
 0x145   :  { %1708 = vmatprep.mubr.msk.bf16.mxu1 %vm100_vm0, %v1998_v35 }
 0x14c   :  { %1709 = vmatmul.mubr.msk.bf16.gmra.mrb[36].mxu1 %vm100_vm0, %v2016_v40 }
 0x14d   :  { %1712 = vmatprep.mubr.msk.bf16.mxu1 %vm100_vm0, %v2018_v41 }
 0x154   :  { %1713 = vmatmul.mubr.msk.bf16.gmra.mrb[40].mxu1 %vm100_vm0, %v2036_v46 }
 0x155   :  { %1716 = vmatprep.mubr.msk.bf16.mxu1 %vm100_vm0, %v2038_v47 }
 0x15c   :  { %1717 = vmatmul.mubr.msk.bf16.gmra.mrb[44].mxu1 %vm100_vm0, %v2050_v50 }
 0x1b7   :  { %v1620_v8 = vpop.f32.mrb[32].mxu0 }
 0x1b8   :  { %v473_v9 = vadd.f32 %v1620_v8, %v2155_v4  ;;  %v464_v14 = vpop.f32.mrb[33].mxu0 }
 0x1b9   :  { %v465_v15 = vadd.f32 %v2155_v4, %v464_v14  ;;  %v1621_v22 = vpop.f32.mrb[34].mxu0 }
 0x1ba   :  { %v476_v23 = vadd.f32 %v1621_v22, %v2155_v4  ;;  %v467_v28 = vpop.f32.mrb[35].mxu0  ;;  %v593_v34 = vmax.f32 %v473_v9, 0.0 }
 0x1bb   :  { %v468_v29 = vadd.f32 %v2155_v4, %v467_v28  ;;  %v591_v40 = vmax.f32 %v465_v15, 0.0 }
 0x1bc   :  { %v594_v35 = vmax.f32 %v476_v23, 0.0 }
 0x1bd   :  { %v592_v41 = vmax.f32 %v468_v29, 0.0 }
 0x1be   :  { %v624_v46 = vpack.c.bf16 %v594_v35, %v593_v34 }
 0x1bf   :  { %v623_v47 = vpack.c.bf16 %v592_v41, %v591_v40  ;;  %v1624_v13 = vpop.f32.mrb[36].mxu0 }
 0x1c0   :  { %v489_v16 = vadd.f32 %v1624_v13, %v2155_v4  ;;  %v480_v17 = vpop.f32.mrb[37].mxu0 }
 0x1c1   :  { %v481_v50 = vadd.f32 %v2155_v4, %v480_v17  ;;  %v1625_v18 = vpop.f32.mrb[38].mxu0  ;;  %1654 = vmatprep.mubr.msk.bf16.mxu0 %vm381_vm1, %v623_v47 }
 0x1c2   :  { %v492_v19 = vadd.f32 %v1625_v18, %v2155_v4  ;;  %v483_v20 = vpop.f32.mrb[39].mxu0  ;;  %1655 = vmatmul.mubr.msk.bf16.vlgmr.msra.gmra.mrb[48].mxu0 %vm381_vm1, %v624_v46  ;;  %v597_v24 = vmax.f32 %v489_v16, 0.0 }
 0x1c3   :  { %v484_v21 = vadd.f32 %v2155_v4, %v483_v20  ;;  %v595_v26 = vmax.f32 %v481_v50, 0.0 }
 0x1c4   :  { %v598_v25 = vmax.f32 %v492_v19, 0.0 }
 0x1c5   :  { %v596_v27 = vmax.f32 %v484_v21, 0.0 }
 0x1c6   :  { %v626_v30 = vpack.c.bf16 %v598_v25, %v597_v24 }
 0x1c7   :  { %v625_v31 = vpack.c.bf16 %v596_v27, %v595_v26  ;;  %v1628_v32 = vpop.f32.mrb[40].mxu0 }
 0x1c8   :  { %v505_v33 = vadd.f32 %v1628_v32, %v2155_v4  ;;  %v496_v36 = vpop.f32.mrb[41].mxu0 }
 0x1c9   :  { %v497_v37 = vadd.f32 %v2155_v4, %v496_v36  ;;  %v1629_v38 = vpop.f32.mrb[42].mxu0  ;;  %1658 = vmatprep.mubr.msk.bf16.mxu0 %vm381_vm1, %v625_v31 }
 0x1ca   :  { %v508_v39 = vadd.f32 %v1629_v38, %v2155_v4  ;;  %v499_v42 = vpop.f32.mrb[43].mxu0  ;;  %1659 = vmatmul.mubr.msk.bf16.gmra.mrb[52].mxu0 %vm381_vm1, %v626_v30  ;;  %v601_v44 = vmax.f32 %v505_v33, 0.0 }
 0x1cb   :  { %v500_v43 = vadd.f32 %v2155_v4, %v499_v42  ;;  %v599_v48 = vmax.f32 %v497_v37, 0.0 }
 0x1cc   :  { %v602_v45 = vmax.f32 %v508_v39, 0.0 }
 0x1cd   :  { %v600_v49 = vmax.f32 %v500_v43, 0.0 }
 0x1ce   :  { %v628_v51 = vpack.c.bf16 %v602_v45, %v601_v44 }
 0x1cf   :  { %v627_v53 = vpack.c.bf16 %v600_v49, %v599_v48  ;;  %v1632_v54 = vpop.f32.mrb[44].mxu0 }
 0x1d0   :  { %v521_v55 = vadd.f32 %v1632_v54, %v2155_v4  ;;  %v512_v56 = vpop.f32.mrb[45].mxu0 }
 0x1d1   :  { %v513_v57 = vadd.f32 %v2155_v4, %v512_v56  ;;  %v1633_v58 = vpop.f32.mrb[46].mxu0  ;;  %1662 = vmatprep.mubr.msk.bf16.mxu0 %vm381_vm1, %v627_v53 }
 0x1d2   :  { %v524_v59 = vadd.f32 %v1633_v58, %v2155_v4  ;;  %v515_v60 = vpop.f32.mrb[47].mxu0  ;;  %1663 = vmatmul.mubr.msk.bf16.gmra.mrb[56].mxu0 %vm381_vm1, %v628_v51  ;;  %v605_v62 = vmax.f32 %v521_v55, 0.0 }
 0x1d3   :  { %v516_v61 = vadd.f32 %v2155_v4, %v515_v60  ;;  %v603_v0 = vmax.f32 %v513_v57, 0.0 }
 0x1d4   :  { %v606_v63 = vmax.f32 %v524_v59, 0.0 }
 0x1d5   :  { %v604_v1 = vmax.f32 %v516_v61, 0.0  ;;  %v2210_v61 = vld [vmem:[%s2315_s6] ss:$0 sm:$0xff] }
 0x1d6   :  { %v630_v2 = vpack.c.bf16 %v606_v63, %v605_v62 }
 0x1d7   :  { %v629_v3 = vpack.c.bf16 %v604_v1, %v603_v0  ;;  %v1636_v5 = vpop.f32.mrb[0].mxu1 }
 0x1d8   :  { %v537_v6 = vadd.f32 %v1636_v5, %v2155_v4  ;;  %v528_v7 = vpop.f32.mrb[1].mxu1 }
 0x1d9   :  { %v529_v10 = vadd.f32 %v2155_v4, %v528_v7  ;;  %v1637_v11 = vpop.f32.mrb[2].mxu1  ;;  %1666 = vmatprep.mubr.msk.bf16.mxu0 %vm381_vm1, %v629_v3 }
 0x1da   :  { %v540_v52 = vadd.f32 %v1637_v11, %v2155_v4  ;;  %v531_v12 = vpop.f32.mrb[3].mxu1  ;;  %1667 = vmatmul.mubr.msk.bf16.gmra.mrb[60].mxu0 %vm381_vm1, %v630_v2  ;;  %v609_v9 = vmax.f32 %v537_v6, 0.0 }
 0x1db   :  { %v532_v8 = vadd.f32 %v2155_v4, %v531_v12  ;;  %v607_v15 = vmax.f32 %v529_v10, 0.0 }
 0x1dc   :  { %v610_v14 = vmax.f32 %v540_v52, 0.0 }
 0x1dd   :  { %v608_v22 = vmax.f32 %v532_v8, 0.0 }
 0x1de   :  { %v632_v23 = vpack.c.bf16 %v610_v14, %v609_v9 }
 0x1df   :  { %v631_v28 = vpack.c.bf16 %v608_v22, %v607_v15  ;;  %v1640_v29 = vpop.f32.mrb[4].mxu1 }
 0x1e0   :  { %v553_v34 = vadd.f32 %v1640_v29, %v2155_v4  ;;  %v544_v35 = vpop.f32.mrb[5].mxu1 }
 0x1e1   :  { %v545_v40 = vadd.f32 %v2155_v4, %v544_v35  ;;  %v1641_v41 = vpop.f32.mrb[6].mxu1  ;;  %1670 = vmatprep.mubr.msk.bf16.mxu0 %vm381_vm1, %v631_v28 }
 0x1e2   :  { %v556_v46 = vadd.f32 %v1641_v41, %v2155_v4  ;;  %v547_v47 = vpop.f32.mrb[7].mxu1  ;;  %1671 = vmatmul.mubr.msk.bf16.gmra.mrb[64].mxu0 %vm381_vm1, %v632_v23  ;;  %v613_v16 = vmax.f32 %v553_v34, 0.0 }
 0x1e3   :  { %v548_v13 = vadd.f32 %v2155_v4, %v547_v47  ;;  %v611_v50 = vmax.f32 %v545_v40, 0.0 }
 0x1e4   :  { %v614_v17 = vmax.f32 %v556_v46, 0.0 }
 0x1e5   :  { %v612_v18 = vmax.f32 %v548_v13, 0.0 }
 0x1e6   :  { %v634_v19 = vpack.c.bf16 %v614_v17, %v613_v16 }
 0x1e7   :  { %v633_v20 = vpack.c.bf16 %v612_v18, %v611_v50  ;;  %v1644_v21 = vpop.f32.mrb[8].mxu1 }
 0x1e8   :  { %v569_v24 = vadd.f32 %v1644_v21, %v2155_v4  ;;  %v560_v25 = vpop.f32.mrb[9].mxu1 }
 0x1e9   :  { %v561_v26 = vadd.f32 %v2155_v4, %v560_v25  ;;  %v1645_v27 = vpop.f32.mrb[10].mxu1  ;;  %1674 = vmatprep.mubr.msk.bf16.mxu0 %vm381_vm1, %v633_v20 }
 0x1ea   :  { %v572_v30 = vadd.f32 %v1645_v27, %v2155_v4  ;;  %v563_v31 = vpop.f32.mrb[11].mxu1  ;;  %1675 = vmatmul.mubr.msk.bf16.gmra.mrb[68].mxu0 %vm381_vm1, %v634_v19  ;;  %v617_v33 = vmax.f32 %v569_v24, 0.0 }
 0x1eb   :  { %v564_v32 = vadd.f32 %v2155_v4, %v563_v31  ;;  %v615_v37 = vmax.f32 %v561_v26, 0.0 }
 0x1ec   :  { %v618_v36 = vmax.f32 %v572_v30, 0.0 }
 0x1ed   :  { %v616_v38 = vmax.f32 %v564_v32, 0.0 }
 0x1ee   :  { %v636_v39 = vpack.c.bf16 %v618_v36, %v617_v33 }
 0x1ef   :  { %v635_v42 = vpack.c.bf16 %v616_v38, %v615_v37  ;;  %v1648_v43 = vpop.f32.mrb[12].mxu1 }
 0x1f0   :  { %v585_v44 = vadd.f32 %v1648_v43, %v2155_v4  ;;  %v576_v45 = vpop.f32.mrb[13].mxu1 }
 0x1f1   :  { %v577_v48 = vadd.f32 %v2155_v4, %v576_v45  ;;  %v1649_v49 = vpop.f32.mrb[14].mxu1  ;;  %1678 = vmatprep.mubr.msk.bf16.mxu0 %vm381_vm1, %v635_v42 }
 0x1f2   :  { %v588_v51 = vadd.f32 %v1649_v49, %v2155_v4  ;;  %v579_v53 = vpop.f32.mrb[15].mxu1  ;;  %1679 = vmatmul.mubr.msk.bf16.gmra.mrb[72].mxu0 %vm381_vm1, %v636_v39  ;;  %v621_v55 = vmax.f32 %v585_v44, 0.0 }
 0x1f3   :  { %v580_v54 = vadd.f32 %v2155_v4, %v579_v53  ;;  %v619_v57 = vmax.f32 %v577_v48, 0.0 }
 0x1f4   :  { %v622_v56 = vmax.f32 %v588_v51, 0.0 }
 0x1f5   :  { %v620_v58 = vmax.f32 %v580_v54, 0.0 }
 0x1f6   :  { %v638_v59 = vpack.c.bf16 %v622_v56, %v621_v55 }
 0x1f7   :  { %v637_v60 = vpack.c.bf16 %v620_v58, %v619_v57 }
 0x1f9   :  { %1682 = vmatprep.mubr.msk.bf16.mxu0 %vm381_vm1, %v637_v60 }
 0x1fa   :  { %1683 = vmatmul.mubr.msk.bf16.gmra.mrb[76].mxu0 %vm381_vm1, %v638_v59 }
 0x295   :  { %v1656_v62 = vpop.f32.mrb[48].mxu0 }
 0x296   :  { %v753_v63 = vadd.f32 %v1656_v62, %v2210_v61  ;;  %v744_v0 = vpop.f32.mrb[49].mxu0 }
 0x297   :  { %v745_v4 = vadd.f32 %v2210_v61, %v744_v0  ;;  %v1657_v1 = vpop.f32.mrb[50].mxu0 }
 0x298   :  { %v756_v2 = vadd.f32 %v1657_v1, %v2210_v61  ;;  %v747_v3 = vpop.f32.mrb[51].mxu0  ;;  %v873_v6 = vmax.f32 %v753_v63, 0.0 }
 0x299   :  { %v748_v5 = vadd.f32 %v2210_v61, %v747_v3  ;;  %v871_v10 = vmax.f32 %v745_v4, 0.0 }
 0x29a   :  { %v874_v7 = vmax.f32 %v756_v2, 0.0 }
 0x29b   :  { %v872_v11 = vmax.f32 %v748_v5, 0.0 }
 0x29c   :  { %v904_v52 = vpack.c.bf16 %v874_v7, %v873_v6 }
 0x29d   :  { %v903_v12 = vpack.c.bf16 %v872_v11, %v871_v10  ;;  %v1660_v8 = vpop.f32.mrb[52].mxu0 }
 0x29e   :  { %v769_v9 = vadd.f32 %v1660_v8, %v2210_v61  ;;  %v760_v14 = vpop.f32.mrb[53].mxu0 }
 0x29f   :  { %v761_v15 = vadd.f32 %v2210_v61, %v760_v14  ;;  %v1661_v22 = vpop.f32.mrb[54].mxu0  ;;  %1724 = vmatprep.mubr.msk.bf16.mxu1 %vm381_vm1, %v903_v12 }
 0x2a0   :  { %v772_v23 = vadd.f32 %v1661_v22, %v2210_v61  ;;  %v763_v28 = vpop.f32.mrb[55].mxu0  ;;  %1725 = vmatmul.mubr.msk.bf16.vlgmr.msra.gmra.mrb[16].mxu1 %vm381_vm1, %v904_v52  ;;  %v877_v34 = vmax.f32 %v769_v9, 0.0 }
 0x2a1   :  { %v764_v29 = vadd.f32 %v2210_v61, %v763_v28  ;;  %v875_v40 = vmax.f32 %v761_v15, 0.0 }
 0x2a2   :  { %v878_v35 = vmax.f32 %v772_v23, 0.0 }
 0x2a3   :  { %v876_v41 = vmax.f32 %v764_v29, 0.0 }
 0x2a4   :  { %v906_v46 = vpack.c.bf16 %v878_v35, %v877_v34 }
 0x2a5   :  { %v905_v47 = vpack.c.bf16 %v876_v41, %v875_v40  ;;  %v1664_v13 = vpop.f32.mrb[56].mxu0 }
 0x2a6   :  { %v785_v16 = vadd.f32 %v1664_v13, %v2210_v61  ;;  %v776_v17 = vpop.f32.mrb[57].mxu0 }
 0x2a7   :  { %v777_v50 = vadd.f32 %v2210_v61, %v776_v17  ;;  %v1665_v18 = vpop.f32.mrb[58].mxu0  ;;  %1728 = vmatprep.mubr.msk.bf16.mxu1 %vm381_vm1, %v905_v47 }
 0x2a8   :  { %v788_v19 = vadd.f32 %v1665_v18, %v2210_v61  ;;  %v779_v20 = vpop.f32.mrb[59].mxu0  ;;  %1729 = vmatmul.mubr.msk.bf16.gmra.mrb[20].mxu1 %vm381_vm1, %v906_v46  ;;  %v881_v24 = vmax.f32 %v785_v16, 0.0 }
 0x2a9   :  { %v780_v21 = vadd.f32 %v2210_v61, %v779_v20  ;;  %v879_v26 = vmax.f32 %v777_v50, 0.0 }
 0x2aa   :  { %v882_v25 = vmax.f32 %v788_v19, 0.0 }
 0x2ab   :  { %v880_v27 = vmax.f32 %v780_v21, 0.0 }
 0x2ac   :  { %v908_v30 = vpack.c.bf16 %v882_v25, %v881_v24 }
 0x2ad   :  { %v907_v31 = vpack.c.bf16 %v880_v27, %v879_v26  ;;  %v1668_v32 = vpop.f32.mrb[60].mxu0 }
 0x2ae   :  { %v801_v33 = vadd.f32 %v1668_v32, %v2210_v61  ;;  %v792_v36 = vpop.f32.mrb[61].mxu0 }
 0x2af   :  { %v793_v37 = vadd.f32 %v2210_v61, %v792_v36  ;;  %v1669_v38 = vpop.f32.mrb[62].mxu0  ;;  %1732 = vmatprep.mubr.msk.bf16.mxu1 %vm381_vm1, %v907_v31 }
 0x2b0   :  { %v804_v39 = vadd.f32 %v1669_v38, %v2210_v61  ;;  %v795_v42 = vpop.f32.mrb[63].mxu0  ;;  %1733 = vmatmul.mubr.msk.bf16.gmra.mrb[24].mxu1 %vm381_vm1, %v908_v30  ;;  %v885_v44 = vmax.f32 %v801_v33, 0.0 }
 0x2b1   :  { %v796_v43 = vadd.f32 %v2210_v61, %v795_v42  ;;  %v883_v48 = vmax.f32 %v793_v37, 0.0 }
 0x2b2   :  { %v886_v45 = vmax.f32 %v804_v39, 0.0 }
 0x2b3   :  { %v884_v49 = vmax.f32 %v796_v43, 0.0  ;;  %v2263_v43 = vld [vmem:[%s2318_s9] ss:$0 sm:$0xff]  ;;  %s1827_s9 = smov [#allocation2]  }
 0x2b4   :  { %v910_v51 = vpack.c.bf16 %v886_v45, %v885_v44  ;;  %s1389_s27 = sshll.u32 %s1827_s9, 4  ;;  %s1390_s27 = int_to_ptr.vmem [resolvable:$true] %s1389_s27 }
 0x2b5   :  { %v909_v53 = vpack.c.bf16 %v884_v49, %v883_v48  ;;  %v1672_v54 = vpop.f32.mrb[64].mxu0  ;;  %s1803_s28 = scalar_lea.vmem %s1390_s27, 4096  ;;  %p1808_p1 = scmp.lt.s32.totalorder %s1390_s27, %s1390_s27 }
 0x2b6   :  { %v817_v55 = vadd.f32 %v1672_v54, %v2210_v61  ;;  %v808_v56 = vpop.f32.mrb[65].mxu0  ;;  %p1804_p0 = scmp.ne.s32.totalorder %s1390_s27, %s1803_s28  ;;  %p1809_p2 = scmp.lt.s32.totalorder %s1803_s28, %s1803_s28 }
 0x2b7   :  { %v809_v57 = vadd.f32 %v2210_v61, %v808_v56  ;;  %v1673_v58 = vpop.f32.mrb[66].mxu0  ;;  %1736 = vmatprep.mubr.msk.bf16.mxu1 %vm381_vm1, %v909_v53 }
 0x2b8   :  { %v820_v59 = vadd.f32 %v1673_v58, %v2210_v61  ;;  %v811_v60 = vpop.f32.mrb[67].mxu0  ;;  %1737 = vmatmul.mubr.msk.bf16.gmra.mrb[28].mxu1 %vm381_vm1, %v910_v51  ;;  %v889_v63 = vmax.f32 %v817_v55, 0.0  ;;  %p1810_p3 = por %p1809_p2, %p1808_p1 }
 0x2b9   :  { %v812_v62 = vadd.f32 %v2210_v61, %v811_v60  ;;  %v887_v4 = vmax.f32 %v809_v57, 0.0 }
 0x2ba   :  { %v890_v0 = vmax.f32 %v820_v59, 0.0  ;;  %p1811_p4 = pnand %p1810_p3, %p1804_p0 }
 0x2bb   :  { %v888_v1 = vmax.f32 %v812_v62, 0.0 }
 0x2bc   :  { %v912_v2 = vpack.c.bf16 %v890_v0, %v889_v63 }
 0x2bd   :  { %v911_v3 = vpack.c.bf16 %v888_v1, %v887_v4  ;;  %v1676_v5 = vpop.f32.mrb[68].mxu0 }
 0x2be   :  { %v833_v6 = vadd.f32 %v1676_v5, %v2210_v61  ;;  %v824_v7 = vpop.f32.mrb[69].mxu0 }
 0x2bf   :  { %v825_v10 = vadd.f32 %v2210_v61, %v824_v7  ;;  %v1677_v11 = vpop.f32.mrb[70].mxu0  ;;  %1740 = vmatprep.mubr.msk.bf16.mxu1 %vm381_vm1, %v911_v3 }
 0x2c0   :  { %v836_v52 = vadd.f32 %v1677_v11, %v2210_v61  ;;  %v827_v12 = vpop.f32.mrb[71].mxu0  ;;  %1741 = vmatmul.mubr.msk.bf16.gmra.mrb[32].mxu1 %vm381_vm1, %v912_v2  ;;  %v893_v9 = vmax.f32 %v833_v6, 0.0 }
 0x2c1   :  { %v828_v8 = vadd.f32 %v2210_v61, %v827_v12  ;;  %v891_v15 = vmax.f32 %v825_v10, 0.0 }
 0x2c2   :  { %v894_v14 = vmax.f32 %v836_v52, 0.0 }
 0x2c3   :  { %v892_v22 = vmax.f32 %v828_v8, 0.0 }
 0x2c4   :  { %v914_v23 = vpack.c.bf16 %v894_v14, %v893_v9 }
 0x2c5   :  { %v913_v28 = vpack.c.bf16 %v892_v22, %v891_v15  ;;  %v1680_v29 = vpop.f32.mrb[72].mxu0 }
 0x2c6   :  { %v849_v34 = vadd.f32 %v1680_v29, %v2210_v61  ;;  %v840_v35 = vpop.f32.mrb[73].mxu0 }
 0x2c7   :  { %v841_v40 = vadd.f32 %v2210_v61, %v840_v35  ;;  %v1681_v41 = vpop.f32.mrb[74].mxu0  ;;  %1744 = vmatprep.mubr.msk.bf16.mxu1 %vm381_vm1, %v913_v28 }
 0x2c8   :  { %v852_v46 = vadd.f32 %v1681_v41, %v2210_v61  ;;  %v843_v47 = vpop.f32.mrb[75].mxu0  ;;  %1745 = vmatmul.mubr.msk.bf16.gmra.mrb[36].mxu1 %vm381_vm1, %v914_v23  ;;  %v897_v16 = vmax.f32 %v849_v34, 0.0 }
 0x2c9   :  { %v844_v13 = vadd.f32 %v2210_v61, %v843_v47  ;;  %v895_v50 = vmax.f32 %v841_v40, 0.0 }
 0x2ca   :  { %v898_v17 = vmax.f32 %v852_v46, 0.0 }
 0x2cb   :  { %v896_v18 = vmax.f32 %v844_v13, 0.0 }
 0x2cc   :  { %v916_v19 = vpack.c.bf16 %v898_v17, %v897_v16 }
 0x2cd   :  { %v915_v20 = vpack.c.bf16 %v896_v18, %v895_v50  ;;  %v1684_v21 = vpop.f32.mrb[76].mxu0 }
 0x2ce   :  { %v865_v24 = vadd.f32 %v1684_v21, %v2210_v61  ;;  %v856_v25 = vpop.f32.mrb[77].mxu0 }
 0x2cf   :  { %v857_v26 = vadd.f32 %v2210_v61, %v856_v25  ;;  %v1685_v27 = vpop.f32.mrb[78].mxu0  ;;  %1748 = vmatprep.mubr.msk.bf16.mxu1 %vm381_vm1, %v915_v20 }
 0x2d0   :  { %v868_v30 = vadd.f32 %v1685_v27, %v2210_v61  ;;  %v859_v31 = vpop.f32.mrb[79].mxu0  ;;  %1749 = vmatmul.mubr.msk.bf16.gmra.mrb[40].mxu1 %vm381_vm1, %v916_v19  ;;  %v901_v33 = vmax.f32 %v865_v24, 0.0 }
 0x2d1   :  { %v860_v32 = vadd.f32 %v2210_v61, %v859_v31  ;;  %v899_v37 = vmax.f32 %v857_v26, 0.0 }
 0x2d2   :  { %v902_v36 = vmax.f32 %v868_v30, 0.0 }
 0x2d3   :  { %v900_v38 = vmax.f32 %v860_v32, 0.0 }
 0x2d4   :  { %v918_v39 = vpack.c.bf16 %v902_v36, %v901_v33 }
 0x2d5   :  { %v917_v42 = vpack.c.bf16 %v900_v38, %v899_v37 }
 0x2d7   :  { %1752 = vmatprep.mubr.msk.bf16.mxu1 %vm381_vm1, %v917_v42 }
 0x2d8   :  { %1753 = vmatmul.mubr.msk.bf16.gmra.mrb[44].mxu1 %vm381_vm1, %v918_v39 }
 0x373   :  { %v1726_v44 = vpop.f32.mrb[16].mxu1 }
 0x374   :  { %v1322_v45 = vadd.f32 %v1726_v44, %v2263_v43  ;;  %v1186_v48 = vpop.f32.mrb[17].mxu1 }
 0x375   :  { %v1320_v61 = vadd.f32 %v2263_v43, %v1186_v48  ;;  %v1727_v49 = vpop.f32.mrb[18].mxu1 }
 0x376   :  { %1354 = vst [vmem:[#allocation2 + $0x10] sm:$0xff] %v1322_v45  ;;  %v1323_v51 = vadd.f32 %v1727_v49, %v2263_v43  ;;  %v1189_v53 = vpop.f32.mrb[19].mxu1 }
 0x377   :  { %1352 = vst [vmem:[#allocation2] sm:$0xff] %v1320_v61  ;;  %v1321_v54 = vadd.f32 %v2263_v43, %v1189_v53 }
 0x378   :  { %1355 = vst [vmem:[#allocation2 + $0x18] sm:$0xff] %v1323_v51 }
 0x379   :  { %1353 = vst [vmem:[#allocation2 + $0x8] sm:$0xff] %v1321_v54 }
 0x37b   :  { %v1730_v55 = vpop.f32.mrb[20].mxu1 }
 0x37c   :  { %v1326_v56 = vadd.f32 %v1730_v55, %v2263_v43  ;;  %v1202_v57 = vpop.f32.mrb[21].mxu1 }
 0x37d   :  { %v1324_v58 = vadd.f32 %v2263_v43, %v1202_v57  ;;  %v1731_v59 = vpop.f32.mrb[22].mxu1 }
 0x37e   :  { %1358 = vst [vmem:[#allocation2 + $0x30] sm:$0xff] %v1326_v56  ;;  %v1327_v60 = vadd.f32 %v1731_v59, %v2263_v43  ;;  %v1205_v62 = vpop.f32.mrb[23].mxu1 }
 0x37f   :  { %1356 = vst [vmem:[#allocation2 + $0x20] sm:$0xff] %v1324_v58  ;;  %v1325_v63 = vadd.f32 %v2263_v43, %v1205_v62 }
 0x380   :  { %1359 = vst [vmem:[#allocation2 + $0x38] sm:$0xff] %v1327_v60 }
 0x381   :  { %1357 = vst [vmem:[#allocation2 + $0x28] sm:$0xff] %v1325_v63 }
 0x383   :  { %v1734_v0 = vpop.f32.mrb[24].mxu1 }
 0x384   :  { %v1330_v4 = vadd.f32 %v1734_v0, %v2263_v43  ;;  %v1218_v1 = vpop.f32.mrb[25].mxu1 }
 0x385   :  { %v1328_v2 = vadd.f32 %v2263_v43, %v1218_v1  ;;  %v1735_v3 = vpop.f32.mrb[26].mxu1 }
 0x386   :  { %1362 = vst [vmem:[#allocation2 + $0x50] sm:$0xff] %v1330_v4  ;;  %v1331_v5 = vadd.f32 %v1735_v3, %v2263_v43  ;;  %v1221_v6 = vpop.f32.mrb[27].mxu1 }
 0x387   :  { %1360 = vst [vmem:[#allocation2 + $0x40] sm:$0xff] %v1328_v2  ;;  %v1329_v7 = vadd.f32 %v2263_v43, %v1221_v6 }
 0x388   :  { %1363 = vst [vmem:[#allocation2 + $0x58] sm:$0xff] %v1331_v5 }
 0x389   :  { %1361 = vst [vmem:[#allocation2 + $0x48] sm:$0xff] %v1329_v7 }
 0x38b   :  { %v1738_v10 = vpop.f32.mrb[28].mxu1 }
 0x38c   :  { %v1334_v11 = vadd.f32 %v1738_v10, %v2263_v43  ;;  %v1234_v52 = vpop.f32.mrb[29].mxu1 }
 0x38d   :  { %v1332_v12 = vadd.f32 %v2263_v43, %v1234_v52  ;;  %v1739_v8 = vpop.f32.mrb[30].mxu1 }
 0x38e   :  { %1366 = vst [vmem:[#allocation2 + $0x70] sm:$0xff] %v1334_v11  ;;  %v1335_v9 = vadd.f32 %v1739_v8, %v2263_v43  ;;  %v1237_v14 = vpop.f32.mrb[31].mxu1 }
 0x38f   :  { %1364 = vst [vmem:[#allocation2 + $0x60] sm:$0xff] %v1332_v12  ;;  %v1333_v15 = vadd.f32 %v2263_v43, %v1237_v14 }
 0x390   :  { %1367 = vst [vmem:[#allocation2 + $0x78] sm:$0xff] %v1335_v9 }
 0x391   :  { %1365 = vst [vmem:[#allocation2 + $0x68] sm:$0xff] %v1333_v15 }
 0x393   :  { %v1742_v22 = vpop.f32.mrb[32].mxu1 }
 0x394   :  { %v1338_v23 = vadd.f32 %v1742_v22, %v2263_v43  ;;  %v1250_v28 = vpop.f32.mrb[33].mxu1 }
 0x395   :  { %v1336_v29 = vadd.f32 %v2263_v43, %v1250_v28  ;;  %v1743_v34 = vpop.f32.mrb[34].mxu1 }
 0x396   :  { %1370 = vst [vmem:[#allocation2 + $0x90] sm:$0xff] %v1338_v23  ;;  %v1339_v35 = vadd.f32 %v1743_v34, %v2263_v43  ;;  %v1253_v40 = vpop.f32.mrb[35].mxu1 }
 0x397   :  { %1368 = vst [vmem:[#allocation2 + $0x80] sm:$0xff] %v1336_v29  ;;  %v1337_v41 = vadd.f32 %v2263_v43, %v1253_v40 }
 0x398   :  { %1371 = vst [vmem:[#allocation2 + $0x98] sm:$0xff] %v1339_v35 }
 0x399   :  { %1369 = vst [vmem:[#allocation2 + $0x88] sm:$0xff] %v1337_v41 }
 0x39b   :  { %v1746_v46 = vpop.f32.mrb[36].mxu1 }
 0x39c   :  { %v1342_v47 = vadd.f32 %v1746_v46, %v2263_v43  ;;  %v1266_v13 = vpop.f32.mrb[37].mxu1 }
 0x39d   :  { %v1340_v16 = vadd.f32 %v2263_v43, %v1266_v13  ;;  %v1747_v17 = vpop.f32.mrb[38].mxu1 }
 0x39e   :  { %1374 = vst [vmem:[#allocation2 + $0xb0] sm:$0xff] %v1342_v47  ;;  %v1343_v50 = vadd.f32 %v1747_v17, %v2263_v43  ;;  %v1269_v18 = vpop.f32.mrb[39].mxu1 }
 0x39f   :  { %1372 = vst [vmem:[#allocation2 + $0xa0] sm:$0xff] %v1340_v16  ;;  %v1341_v19 = vadd.f32 %v2263_v43, %v1269_v18 }
 0x3a0   :  { %1375 = vst [vmem:[#allocation2 + $0xb8] sm:$0xff] %v1343_v50 }
 0x3a1   :  { %1373 = vst [vmem:[#allocation2 + $0xa8] sm:$0xff] %v1341_v19 }
 0x3a3   :  { %v1750_v20 = vpop.f32.mrb[40].mxu1 }
 0x3a4   :  { %v1346_v21 = vadd.f32 %v1750_v20, %v2263_v43  ;;  %v1282_v24 = vpop.f32.mrb[41].mxu1 }
 0x3a5   :  { %v1344_v25 = vadd.f32 %v2263_v43, %v1282_v24  ;;  %v1751_v26 = vpop.f32.mrb[42].mxu1 }
 0x3a6   :  { %1378 = vst [vmem:[#allocation2 + $0xd0] sm:$0xff] %v1346_v21  ;;  %v1347_v27 = vadd.f32 %v1751_v26, %v2263_v43  ;;  %v1285_v30 = vpop.f32.mrb[43].mxu1 }
 0x3a7   :  { %1376 = vst [vmem:[#allocation2 + $0xc0] sm:$0xff] %v1344_v25  ;;  %v1345_v31 = vadd.f32 %v2263_v43, %v1285_v30 }
 0x3a8   :  { %1379 = vst [vmem:[#allocation2 + $0xd8] sm:$0xff] %v1347_v27 }
 0x3a9   :  { %1377 = vst [vmem:[#allocation2 + $0xc8] sm:$0xff] %v1345_v31 }
 0x3ab   :  { %v1754_v32 = vpop.f32.mrb[44].mxu1 }
 0x3ac   :  { %v1350_v33 = vadd.f32 %v1754_v32, %v2263_v43  ;;  %v1298_v36 = vpop.f32.mrb[45].mxu1 }
 0x3ad   :  { %v1348_v37 = vadd.f32 %v2263_v43, %v1298_v36  ;;  %v1755_v38 = vpop.f32.mrb[46].mxu1 }
 0x3ae   :  { %1382 = vst [vmem:[#allocation2 + $0xf0] sm:$0xff] %v1350_v33  ;;  %v1351_v39 = vadd.f32 %v1755_v38, %v2263_v43  ;;  %v1301_v42 = vpop.f32.mrb[47].mxu1 }
 0x3af   :  { %1380 = vst [vmem:[#allocation2 + $0xe0] sm:$0xff] %v1348_v37  ;;  %v1349_v44 = vadd.f32 %v2263_v43, %v1301_v42 }
 0x3b0   :  { %1383 = vst [vmem:[#allocation2 + $0xf8] sm:$0xff] %v1351_v39 }
 0x3b1   :  { %1381 = vst [vmem:[#allocation2 + $0xe8] sm:$0xff] %v1349_v44 }
 0x3b2   :  { %1814 = shalt.err (!%p1811_p4)
}
 0x3b3   :  { %s1815_s11 = scalar_lea.hbm %s2319_s10, 4096 }
 0x3b4   :  { %p1816_p5 = scmp.ne.s32.totalorder %s2319_s10, %s1815_s11  ;;  %p1819_p6 = scmp.lt.u32.totalorder %s1815_s11, %s2319_s10 }
 0x3b6   :  { %p1821_p7 = pnand %p1819_p6, %p1816_p5 }
 0x3b8   :  { %1824 = shalt.err (!%p1821_p7)
}
 0x3b9   :  { %s1828_s16 = smov 128   ;;  %s1829_s17 = smov 8  }
 0x3ba   :  { %1395 = dma.vmem_to_hbm [thread:$0]  %s1390_s27, 4096, %s2319_s10, [#allocation3], %s1828_s16, %s1828_s16, %s1829_s17  }
 0x3bb   :  { %1825 = dma.done.wait [#allocation3], 4096  }
 0x3bc   :  { %1826 = vsyncadd [#allocation3], 4294963200 }
 0x3bd   :  { %1399 = vsyncpa [#allocation3], 1 }

</bundles_post_ra>
